<compile_context>
chip_gen: v5e
topology: v5e:2x2
jax: 0.10.0
libtpu: 0.0.40
codegen_flags: <defaults>
</compile_context>

<pallas_src>
import jax
import jax.numpy as jnp
from jax.experimental import pallas as pl
from jax.experimental.pallas import tpu as pltpu


def decoder_kernel(ids_ref,                    # scalar prefetch (SMEM)
                   emb_hbm, h_ref, c_ref, wcat_ref, bg_ref, wfc_ref, bfc_ref,
                   pred_ref, hout_ref, cout_ref,
                   x_sc, h_sc, c_sc, gsem):
    j = pl.program_id(0)
    B, E = x_sc.shape
    H = h_ref.shape[1]
    V = emb_hbm.shape[0]

    @pl.when(j == 0)
    def _lstm_step():
        # ---- Embedding gather: DMA only the B needed rows from HBM ----
        # (clamp ids so an out-of-range token reads a real row instead of OOB)
        for b in range(B):
            idx = jnp.clip(ids_ref[b], 0, V - 1)
            pltpu.make_async_copy(emb_hbm.at[pl.ds(idx, 1)],
                                  x_sc.at[pl.ds(b, 1)],
                                  gsem.at[b]).start()
        for b in range(B):
            idx = jnp.clip(ids_ref[b], 0, V - 1)
            pltpu.make_async_copy(emb_hbm.at[pl.ds(idx, 1)],
                                  x_sc.at[pl.ds(b, 1)],
                                  gsem.at[b]).wait()
        # nn.Dropout(0.2): eval-mode identity.

        # ---- Fused LSTM cell: single MXU dot on concat([x, h]) ----
        w_dt = wcat_ref.dtype
        x = x_sc[...].astype(w_dt)                         # (B, E)  bf16
        h_prev = h_ref[...]                                # (B, H)  f32
        xh = jnp.concatenate([x, h_prev.astype(w_dt)], axis=-1)   # (B, E+H)
        gates = (jnp.dot(xh, wcat_ref[...],
                         preferred_element_type=jnp.float32)
                 + bg_ref[...])                            # (B, 4H) f32

        i_g = jax.nn.sigmoid(gates[:, 0 * H:1 * H])
        f_g = jax.nn.sigmoid(gates[:, 1 * H:2 * H])
        g_g = jnp.tanh(gates[:, 2 * H:3 * H])
        o_g = jax.nn.sigmoid(gates[:, 3 * H:4 * H])

        c_new = f_g * c_ref[...] + i_g * g_g
        h_new = o_g * jnp.tanh(c_new)

        h_sc[...] = h_new
        c_sc[...] = c_new
        hout_ref[...] = h_new                              # written once, block
        cout_ref[...] = c_new                              # index is constant

    # ---- fc_out: one vocab tile per grid step (weight stream is pipelined) ----
    pred_ref[...] = (jnp.dot(h_sc[...].astype(wfc_ref.dtype), wfc_ref[...],
                             preferred_element_type=jnp.float32)
                     + bfc_ref[...])


def decoder_forward(input_ids, hidden, cell, params, *, tile_v=256):
    """input_ids: (B,) int32; hidden, cell: (1, B, H) f32.
    Returns (prediction (B, V), hidden (1, B, H), cell (1, B, H))."""
    emb = params["embedding"]          # (V, E)    f32
    wcat = params["w_cat"]             # (E+H, 4H) bf16
    bg = params["b_gates"]             # (1, 4H)   f32
    wfc = params["w_fc_t"]             # (H, V)    bf16
    bfc = params["b_fc"]               # (1, V)    f32

    B = input_ids.shape[0]
    V, E = emb.shape
    H = hidden.shape[-1]

    assert tile_v % 128 == 0, "vocab tile must be lane-aligned"
    nv = pl.cdiv(V, tile_v)
    v_pad = nv * tile_v
    if v_pad != V:                     # pad projection to a whole number of tiles
        wfc = jnp.pad(wfc, ((0, 0), (0, v_pad - V)))
        bfc = jnp.pad(bfc, ((0, 0), (0, v_pad - V)))

    ids = input_ids.astype(jnp.int32)
    h0 = hidden.reshape(B, H)
    c0 = cell.reshape(B, H)

    grid_spec = pltpu.PrefetchScalarGridSpec(
        num_scalar_prefetch=1,                 # ids -> SMEM
        grid=(nv,),
        in_specs=[
            pl.BlockSpec(memory_space=pl.ANY),                    # emb stays in HBM
            pl.BlockSpec((B, H), lambda j, ids: (0, 0)),          # h0
            pl.BlockSpec((B, H), lambda j, ids: (0, 0)),          # c0
            pl.BlockSpec((E + H, 4 * H), lambda j, ids: (0, 0)),  # W_cat (resident)
            pl.BlockSpec((1, 4 * H), lambda j, ids: (0, 0)),      # b_gates
            pl.BlockSpec((H, tile_v), lambda j, ids: (0, j)),     # W_fc tile (streamed)
            pl.BlockSpec((1, tile_v), lambda j, ids: (0, j)),     # b_fc tile
        ],
        out_specs=[
            pl.BlockSpec((B, tile_v), lambda j, ids: (0, j)),     # prediction tile
            pl.BlockSpec((B, H), lambda j, ids: (0, 0)),          # h_new
            pl.BlockSpec((B, H), lambda j, ids: (0, 0)),          # c_new
        ],
        scratch_shapes=[
            pltpu.VMEM((B, E), emb.dtype),        # gathered embeddings
            pltpu.VMEM((B, H), jnp.float32),      # h_new (reused by every vocab tile)
            pltpu.VMEM((B, H), jnp.float32),      # c_new
            pltpu.SemaphoreType.DMA((B,)),        # gather-DMA semaphores
        ],
    )

    # Note: could also alias h0->h_new / c0->c_new via input_output_aliases to
    # save one small (B,H) writeback; kept separate here for clarity.
    pred, h_new, c_new = pl.pallas_call(
        decoder_kernel,
        out_shape=(
            jax.ShapeDtypeStruct((B, v_pad), jnp.float32),
            jax.ShapeDtypeStruct((B, H), jnp.float32),
            jax.ShapeDtypeStruct((B, H), jnp.float32),
        ),
        grid_spec=grid_spec,
        compiler_params=pltpu.CompilerParams(
            # Vocab axis must be sequential: the LSTM state is computed once at
            # j == 0 and reused from VMEM scratch by all later vocab tiles.
            dimension_semantics=("arbitrary",),
            vmem_limit_bytes=32 * 1024 * 1024,
        ),
    )(ids, emb, h0, c0, wcat, bg, wfc, bfc)

    return pred[:, :V], h_new.reshape(1, B, H), c_new.reshape(1, B, H)


def make_params(key, output_dim, emb_dim, hid_dim):
    ks = jax.random.split(key, 7)
    scale = 0.1
    embedding = jax.random.normal(ks[0], (output_dim, emb_dim), jnp.float32) * scale
    w_ih = jax.random.normal(ks[1], (4 * hid_dim, emb_dim), jnp.float32) * scale
    w_hh = jax.random.normal(ks[2], (4 * hid_dim, hid_dim), jnp.float32) * scale
    b_ih = jax.random.normal(ks[3], (4 * hid_dim,), jnp.float32) * scale
    b_hh = jax.random.normal(ks[4], (4 * hid_dim,), jnp.float32) * scale
    w_fc = jax.random.normal(ks[5], (output_dim, hid_dim), jnp.float32) * scale
    b_fc = jax.random.normal(ks[6], (output_dim,), jnp.float32) * scale
    w_cat = jnp.concatenate([w_ih.T, w_hh.T], axis=0)       # (E+H, 4H)
    return {
        "embedding": embedding,                              # f32 (gathered rows: tiny traffic)
        "w_cat": w_cat.astype(jnp.bfloat16),                 # fused LSTM weights, bf16
        "b_gates": (b_ih + b_hh).reshape(1, -1),             # f32
        "w_fc_t": w_fc.T.astype(jnp.bfloat16),               # (H, V) bf16 (dominant stream)
        "b_fc": b_fc.reshape(1, -1),                         # f32
    }


def _reference(input_ids, hidden, cell, params):
    # Pure-JAX reference with the same dtype flow (bf16 weights, f32 accumulate).
    V = params["embedding"].shape[0]
    ids = jnp.clip(input_ids, 0, V - 1)
    x = params["embedding"][ids]                             # (B, E) f32
    h0, c0 = hidden[0], cell[0]
    H = h0.shape[-1]
    w_dt = params["w_cat"].dtype
    xh = jnp.concatenate([x.astype(w_dt), h0.astype(w_dt)], axis=-1)
    gates = (jnp.dot(xh, params["w_cat"], preferred_element_type=jnp.float32)
             + params["b_gates"])
    i = jax.nn.sigmoid(gates[:, :H])
    f = jax.nn.sigmoid(gates[:, H:2 * H])
    g = jnp.tanh(gates[:, 2 * H:3 * H])
    o = jax.nn.sigmoid(gates[:, 3 * H:])
    c1 = f * c0 + i * g
    h1 = o * jnp.tanh(c1)
    pred = (jnp.dot(h1.astype(params["w_fc_t"].dtype), params["w_fc_t"],
                    preferred_element_type=jnp.float32)
            + params["b_fc"])
    return pred, h1[None], c1[None]


if __name__ == "__main__":
    # Lane-aligned small shapes: V=512, E=128, H=128, B=8; TILE_V=256 -> 2 vocab tiles.
    output_dim, emb_dim, hid_dim, batch = 512, 128, 128, 8
    tile_v = 256

    key = jax.random.PRNGKey(0)
    k_par, k_ids, k_h, k_c = jax.random.split(key, 4)

    params = make_params(k_par, output_dim, emb_dim, hid_dim)
    input_ids = jax.random.randint(k_ids, (batch,), 0, output_dim, jnp.int32)
    hidden = jax.random.normal(k_h, (1, batch, hid_dim), jnp.float32)
    cell = jax.random.normal(k_c, (1, batch, hid_dim), jnp.float32)

    pred, h_new, c_new = decoder_forward(input_ids, hidden, cell, params,
                                         tile_v=tile_v)
    jax.block_until_ready((pred, h_new, c_new))

    pred_ref, h_ref, c_ref = _reference(input_ids, hidden, cell, params)
    assert pred.shape == (batch, output_dim)
    assert jnp.allclose(pred, pred_ref, atol=1e-3, rtol=1e-3)
    assert jnp.allclose(h_new, h_ref, atol=1e-3, rtol=1e-3)
    assert jnp.allclose(c_new, c_ref, atol=1e-3, rtol=1e-3)

    print("KERNEL_OK")
</pallas_src>

<mosaic_0001>
module attributes {stable_mosaic.version = 11 : i64} {
  func.func @decoder_kernel(%arg0: i32, %arg1: memref<8xi32, #tpu.memory_space<smem>>, %arg2: memref<512x128xf32, #tpu.memory_space<any>>, %arg3: memref<8x128xf32, #tpu.memory_space<vmem>>, %arg4: memref<8x128xf32, #tpu.memory_space<vmem>>, %arg5: memref<256x512xbf16, #tpu.memory_space<vmem>>, %arg6: memref<1x512xf32, #tpu.memory_space<vmem>>, %arg7: memref<128x256xbf16, #tpu.memory_space<vmem>>, %arg8: memref<1x256xf32, #tpu.memory_space<vmem>>, %arg9: memref<8x256xf32, #tpu.memory_space<vmem>>, %arg10: memref<8x128xf32, #tpu.memory_space<vmem>>, %arg11: memref<8x128xf32, #tpu.memory_space<vmem>>, %arg12: memref<8x128xf32, #tpu.memory_space<vmem>>, %arg13: memref<8x128xf32, #tpu.memory_space<vmem>>, %arg14: memref<8x128xf32, #tpu.memory_space<vmem>>, %arg15: memref<8x!tpu.dma_semaphore, #tpu.memory_space<semaphore_mem>>) attributes {dimension_semantics = [#tpu.dimension_semantics<arbitrary>], iteration_bounds = array<i64: 2>, scalar_prefetch = 1 : i64, scratch_operands = 4 : i64, tpu.core_type = #tpu.core_type<tc>, window_params = [{}, {pipeline_mode = #tpu.pipeline_mode<synchronous>, transform_indices = @transform_1, window_bounds = array<i64: 8, 128>}, {pipeline_mode = #tpu.pipeline_mode<synchronous>, transform_indices = @transform_2, window_bounds = array<i64: 8, 128>}, {pipeline_mode = #tpu.pipeline_mode<synchronous>, transform_indices = @transform_3, window_bounds = array<i64: 256, 512>}, {pipeline_mode = #tpu.pipeline_mode<synchronous>, transform_indices = @transform_4, window_bounds = array<i64: 1, 512>}, {transform_indices = @transform_5, window_bounds = array<i64: 128, 256>}, {transform_indices = @transform_6, window_bounds = array<i64: 1, 256>}, {transform_indices = @transform_7, window_bounds = array<i64: 8, 256>}, {pipeline_mode = #tpu.pipeline_mode<synchronous>, transform_indices = @transform_8, window_bounds = array<i64: 8, 128>}, {pipeline_mode = #tpu.pipeline_mode<synchronous>, transform_indices = @transform_9, window_bounds = array<i64: 8, 128>}]} {
    %c0_i32 = arith.constant 0 : i32
    %0 = arith.cmpi eq, %arg0, %c0_i32 : i32
    %1 = arith.extui %0 : i1 to i32
    %c0_i32_0 = arith.constant 0 : i32
    %2 = arith.cmpi ne, %1, %c0_i32_0 : i32
    scf.if %2 {
      %c0_8 = arith.constant 0 : index
      %11 = memref.load %arg1[%c0_8] : memref<8xi32, #tpu.memory_space<smem>>
      %c0_i32_9 = arith.constant 0 : i32
      %c511_i32 = arith.constant 511 : i32
      %12 = arith.maxsi %c0_i32_9, %11 : i32
      %13 = arith.minsi %c511_i32, %12 : i32
      %c0_i32_10 = arith.constant 0 : i32
      %c0_i32_11 = arith.constant 0 : i32
      %14 = tpu.memref_slice %arg2[%13, %c0_i32_11] : memref<512x128xf32, #tpu.memory_space<any>> -> memref<1x128xf32, #tpu.memory_space<any>>
      %c0_i32_12 = arith.constant 0 : i32
      %c0_i32_13 = arith.constant 0 : i32
      %15 = tpu.memref_slice %arg12[%c0_i32_12, %c0_i32_13] : memref<8x128xf32, #tpu.memory_space<vmem>> -> memref<1x128xf32, #tpu.memory_space<vmem>>
      %16 = tpu.memref_slice %arg15[%c0_i32_10] : memref<8x!tpu.dma_semaphore, #tpu.memory_space<semaphore_mem>> -> memref<1x!tpu.dma_semaphore, #tpu.memory_space<semaphore_mem>>
      %17 = tpu.memref_squeeze %16 : memref<1x!tpu.dma_semaphore, #tpu.memory_space<semaphore_mem>> -> memref<!tpu.dma_semaphore, #tpu.memory_space<semaphore_mem>>
      tpu.enqueue_dma source(%14 : memref<1x128xf32, #tpu.memory_space<any>>) target(%15 : memref<1x128xf32, #tpu.memory_space<vmem>>) target_semaphore(%17 : memref<!tpu.dma_semaphore, #tpu.memory_space<semaphore_mem>>)
      %c1 = arith.constant 1 : index
      %18 = memref.load %arg1[%c1] : memref<8xi32, #tpu.memory_space<smem>>
      %c0_i32_14 = arith.constant 0 : i32
      %c511_i32_15 = arith.constant 511 : i32
      %19 = arith.maxsi %c0_i32_14, %18 : i32
      %20 = arith.minsi %c511_i32_15, %19 : i32
      %c1_i32 = arith.constant 1 : i32
      %c0_i32_16 = arith.constant 0 : i32
      %21 = tpu.memref_slice %arg2[%20, %c0_i32_16] : memref<512x128xf32, #tpu.memory_space<any>> -> memref<1x128xf32, #tpu.memory_space<any>>
      %c1_i32_17 = arith.constant 1 : i32
      %c0_i32_18 = arith.constant 0 : i32
      %22 = tpu.memref_slice %arg12[%c1_i32_17, %c0_i32_18] : memref<8x128xf32, #tpu.memory_space<vmem>> -> memref<1x128xf32, #tpu.memory_space<vmem>>
      %23 = tpu.memref_slice %arg15[%c1_i32] : memref<8x!tpu.dma_semaphore, #tpu.memory_space<semaphore_mem>> -> memref<1x!tpu.dma_semaphore, #tpu.memory_space<semaphore_mem>>
      %24 = tpu.memref_squeeze %23 : memref<1x!tpu.dma_semaphore, #tpu.memory_space<semaphore_mem>> -> memref<!tpu.dma_semaphore, #tpu.memory_space<semaphore_mem>>
      tpu.enqueue_dma source(%21 : memref<1x128xf32, #tpu.memory_space<any>>) target(%22 : memref<1x128xf32, #tpu.memory_space<vmem>>) target_semaphore(%24 : memref<!tpu.dma_semaphore, #tpu.memory_space<semaphore_mem>>)
      %c2 = arith.constant 2 : index
      %25 = memref.load %arg1[%c2] : memref<8xi32, #tpu.memory_space<smem>>
      %c0_i32_19 = arith.constant 0 : i32
      %c511_i32_20 = arith.constant 511 : i32
      %26 = arith.maxsi %c0_i32_19, %25 : i32
      %27 = arith.minsi %c511_i32_20, %26 : i32
      %c2_i32 = arith.constant 2 : i32
      %c0_i32_21 = arith.constant 0 : i32
      %28 = tpu.memref_slice %arg2[%27, %c0_i32_21] : memref<512x128xf32, #tpu.memory_space<any>> -> memref<1x128xf32, #tpu.memory_space<any>>
      %c2_i32_22 = arith.constant 2 : i32
      %c0_i32_23 = arith.constant 0 : i32
      %29 = tpu.memref_slice %arg12[%c2_i32_22, %c0_i32_23] : memref<8x128xf32, #tpu.memory_space<vmem>> -> memref<1x128xf32, #tpu.memory_space<vmem>>
      %30 = tpu.memref_slice %arg15[%c2_i32] : memref<8x!tpu.dma_semaphore, #tpu.memory_space<semaphore_mem>> -> memref<1x!tpu.dma_semaphore, #tpu.memory_space<semaphore_mem>>
      %31 = tpu.memref_squeeze %30 : memref<1x!tpu.dma_semaphore, #tpu.memory_space<semaphore_mem>> -> memref<!tpu.dma_semaphore, #tpu.memory_space<semaphore_mem>>
      tpu.enqueue_dma source(%28 : memref<1x128xf32, #tpu.memory_space<any>>) target(%29 : memref<1x128xf32, #tpu.memory_space<vmem>>) target_semaphore(%31 : memref<!tpu.dma_semaphore, #tpu.memory_space<semaphore_mem>>)
      %c3 = arith.constant 3 : index
      %32 = memref.load %arg1[%c3] : memref<8xi32, #tpu.memory_space<smem>>
      %c0_i32_24 = arith.constant 0 : i32
      %c511_i32_25 = arith.constant 511 : i32
      %33 = arith.maxsi %c0_i32_24, %32 : i32
      %34 = arith.minsi %c511_i32_25, %33 : i32
      %c3_i32 = arith.constant 3 : i32
      %c0_i32_26 = arith.constant 0 : i32
      %35 = tpu.memref_slice %arg2[%34, %c0_i32_26] : memref<512x128xf32, #tpu.memory_space<any>> -> memref<1x128xf32, #tpu.memory_space<any>>
      %c3_i32_27 = arith.constant 3 : i32
      %c0_i32_28 = arith.constant 0 : i32
      %36 = tpu.memref_slice %arg12[%c3_i32_27, %c0_i32_28] : memref<8x128xf32, #tpu.memory_space<vmem>> -> memref<1x128xf32, #tpu.memory_space<vmem>>
      %37 = tpu.memref_slice %arg15[%c3_i32] : memref<8x!tpu.dma_semaphore, #tpu.memory_space<semaphore_mem>> -> memref<1x!tpu.dma_semaphore, #tpu.memory_space<semaphore_mem>>
      %38 = tpu.memref_squeeze %37 : memref<1x!tpu.dma_semaphore, #tpu.memory_space<semaphore_mem>> -> memref<!tpu.dma_semaphore, #tpu.memory_space<semaphore_mem>>
      tpu.enqueue_dma source(%35 : memref<1x128xf32, #tpu.memory_space<any>>) target(%36 : memref<1x128xf32, #tpu.memory_space<vmem>>) target_semaphore(%38 : memref<!tpu.dma_semaphore, #tpu.memory_space<semaphore_mem>>)
      %c4 = arith.constant 4 : index
      %39 = memref.load %arg1[%c4] : memref<8xi32, #tpu.memory_space<smem>>
      %c0_i32_29 = arith.constant 0 : i32
      %c511_i32_30 = arith.constant 511 : i32
      %40 = arith.maxsi %c0_i32_29, %39 : i32
      %41 = arith.minsi %c511_i32_30, %40 : i32
      %c4_i32 = arith.constant 4 : i32
      %c0_i32_31 = arith.constant 0 : i32
      %42 = tpu.memref_slice %arg2[%41, %c0_i32_31] : memref<512x128xf32, #tpu.memory_space<any>> -> memref<1x128xf32, #tpu.memory_space<any>>
      %c4_i32_32 = arith.constant 4 : i32
      %c0_i32_33 = arith.constant 0 : i32
      %43 = tpu.memref_slice %arg12[%c4_i32_32, %c0_i32_33] : memref<8x128xf32, #tpu.memory_space<vmem>> -> memref<1x128xf32, #tpu.memory_space<vmem>>
      %44 = tpu.memref_slice %arg15[%c4_i32] : memref<8x!tpu.dma_semaphore, #tpu.memory_space<semaphore_mem>> -> memref<1x!tpu.dma_semaphore, #tpu.memory_space<semaphore_mem>>
      %45 = tpu.memref_squeeze %44 : memref<1x!tpu.dma_semaphore, #tpu.memory_space<semaphore_mem>> -> memref<!tpu.dma_semaphore, #tpu.memory_space<semaphore_mem>>
      tpu.enqueue_dma source(%42 : memref<1x128xf32, #tpu.memory_space<any>>) target(%43 : memref<1x128xf32, #tpu.memory_space<vmem>>) target_semaphore(%45 : memref<!tpu.dma_semaphore, #tpu.memory_space<semaphore_mem>>)
      %c5 = arith.constant 5 : index
      %46 = memref.load %arg1[%c5] : memref<8xi32, #tpu.memory_space<smem>>
      %c0_i32_34 = arith.constant 0 : i32
      %c511_i32_35 = arith.constant 511 : i32
      %47 = arith.maxsi %c0_i32_34, %46 : i32
      %48 = arith.minsi %c511_i32_35, %47 : i32
      %c5_i32 = arith.constant 5 : i32
      %c0_i32_36 = arith.constant 0 : i32
      %49 = tpu.memref_slice %arg2[%48, %c0_i32_36] : memref<512x128xf32, #tpu.memory_space<any>> -> memref<1x128xf32, #tpu.memory_space<any>>
      %c5_i32_37 = arith.constant 5 : i32
      %c0_i32_38 = arith.constant 0 : i32
      %50 = tpu.memref_slice %arg12[%c5_i32_37, %c0_i32_38] : memref<8x128xf32, #tpu.memory_space<vmem>> -> memref<1x128xf32, #tpu.memory_space<vmem>>
      %51 = tpu.memref_slice %arg15[%c5_i32] : memref<8x!tpu.dma_semaphore, #tpu.memory_space<semaphore_mem>> -> memref<1x!tpu.dma_semaphore, #tpu.memory_space<semaphore_mem>>
      %52 = tpu.memref_squeeze %51 : memref<1x!tpu.dma_semaphore, #tpu.memory_space<semaphore_mem>> -> memref<!tpu.dma_semaphore, #tpu.memory_space<semaphore_mem>>
      tpu.enqueue_dma source(%49 : memref<1x128xf32, #tpu.memory_space<any>>) target(%50 : memref<1x128xf32, #tpu.memory_space<vmem>>) target_semaphore(%52 : memref<!tpu.dma_semaphore, #tpu.memory_space<semaphore_mem>>)
      %c6 = arith.constant 6 : index
      %53 = memref.load %arg1[%c6] : memref<8xi32, #tpu.memory_space<smem>>
      %c0_i32_39 = arith.constant 0 : i32
      %c511_i32_40 = arith.constant 511 : i32
      %54 = arith.maxsi %c0_i32_39, %53 : i32
      %55 = arith.minsi %c511_i32_40, %54 : i32
      %c6_i32 = arith.constant 6 : i32
      %c0_i32_41 = arith.constant 0 : i32
      %56 = tpu.memref_slice %arg2[%55, %c0_i32_41] : memref<512x128xf32, #tpu.memory_space<any>> -> memref<1x128xf32, #tpu.memory_space<any>>
      %c6_i32_42 = arith.constant 6 : i32
      %c0_i32_43 = arith.constant 0 : i32
      %57 = tpu.memref_slice %arg12[%c6_i32_42, %c0_i32_43] : memref<8x128xf32, #tpu.memory_space<vmem>> -> memref<1x128xf32, #tpu.memory_space<vmem>>
      %58 = tpu.memref_slice %arg15[%c6_i32] : memref<8x!tpu.dma_semaphore, #tpu.memory_space<semaphore_mem>> -> memref<1x!tpu.dma_semaphore, #tpu.memory_space<semaphore_mem>>
      %59 = tpu.memref_squeeze %58 : memref<1x!tpu.dma_semaphore, #tpu.memory_space<semaphore_mem>> -> memref<!tpu.dma_semaphore, #tpu.memory_space<semaphore_mem>>
      tpu.enqueue_dma source(%56 : memref<1x128xf32, #tpu.memory_space<any>>) target(%57 : memref<1x128xf32, #tpu.memory_space<vmem>>) target_semaphore(%59 : memref<!tpu.dma_semaphore, #tpu.memory_space<semaphore_mem>>)
      %c7 = arith.constant 7 : index
      %60 = memref.load %arg1[%c7] : memref<8xi32, #tpu.memory_space<smem>>
      %c0_i32_44 = arith.constant 0 : i32
      %c511_i32_45 = arith.constant 511 : i32
      %61 = arith.maxsi %c0_i32_44, %60 : i32
      %62 = arith.minsi %c511_i32_45, %61 : i32
      %c7_i32 = arith.constant 7 : i32
      %c0_i32_46 = arith.constant 0 : i32
      %63 = tpu.memref_slice %arg2[%62, %c0_i32_46] : memref<512x128xf32, #tpu.memory_space<any>> -> memref<1x128xf32, #tpu.memory_space<any>>
      %c7_i32_47 = arith.constant 7 : i32
      %c0_i32_48 = arith.constant 0 : i32
      %64 = tpu.memref_slice %arg12[%c7_i32_47, %c0_i32_48] : memref<8x128xf32, #tpu.memory_space<vmem>> -> memref<1x128xf32, #tpu.memory_space<vmem>>
      %65 = tpu.memref_slice %arg15[%c7_i32] : memref<8x!tpu.dma_semaphore, #tpu.memory_space<semaphore_mem>> -> memref<1x!tpu.dma_semaphore, #tpu.memory_space<semaphore_mem>>
      %66 = tpu.memref_squeeze %65 : memref<1x!tpu.dma_semaphore, #tpu.memory_space<semaphore_mem>> -> memref<!tpu.dma_semaphore, #tpu.memory_space<semaphore_mem>>
      tpu.enqueue_dma source(%63 : memref<1x128xf32, #tpu.memory_space<any>>) target(%64 : memref<1x128xf32, #tpu.memory_space<vmem>>) target_semaphore(%66 : memref<!tpu.dma_semaphore, #tpu.memory_space<semaphore_mem>>)
      %c0_49 = arith.constant 0 : index
      %67 = memref.load %arg1[%c0_49] : memref<8xi32, #tpu.memory_space<smem>>
      %c0_i32_50 = arith.constant 0 : i32
      %c511_i32_51 = arith.constant 511 : i32
      %68 = arith.maxsi %c0_i32_50, %67 : i32
      %69 = arith.minsi %c511_i32_51, %68 : i32
      %c0_i32_52 = arith.constant 0 : i32
      %c0_i32_53 = arith.constant 0 : i32
      %70 = tpu.memref_slice %arg2[%69, %c0_i32_53] : memref<512x128xf32, #tpu.memory_space<any>> -> memref<1x128xf32, #tpu.memory_space<any>>
      %c0_i32_54 = arith.constant 0 : i32
      %c0_i32_55 = arith.constant 0 : i32
      %71 = tpu.memref_slice %arg12[%c0_i32_54, %c0_i32_55] : memref<8x128xf32, #tpu.memory_space<vmem>> -> memref<1x128xf32, #tpu.memory_space<vmem>>
      %72 = tpu.memref_slice %arg15[%c0_i32_52] : memref<8x!tpu.dma_semaphore, #tpu.memory_space<semaphore_mem>> -> memref<1x!tpu.dma_semaphore, #tpu.memory_space<semaphore_mem>>
      %73 = tpu.memref_squeeze %72 : memref<1x!tpu.dma_semaphore, #tpu.memory_space<semaphore_mem>> -> memref<!tpu.dma_semaphore, #tpu.memory_space<semaphore_mem>>
      tpu.wait_dma2 semaphore(%73 : memref<!tpu.dma_semaphore, #tpu.memory_space<semaphore_mem>>) src(%70 : memref<1x128xf32, #tpu.memory_space<any>>) dst(%71 : memref<1x128xf32, #tpu.memory_space<vmem>>)
      %c1_56 = arith.constant 1 : index
      %74 = memref.load %arg1[%c1_56] : memref<8xi32, #tpu.memory_space<smem>>
      %c0_i32_57 = arith.constant 0 : i32
      %c511_i32_58 = arith.constant 511 : i32
      %75 = arith.maxsi %c0_i32_57, %74 : i32
      %76 = arith.minsi %c511_i32_58, %75 : i32
      %c1_i32_59 = arith.constant 1 : i32
      %c0_i32_60 = arith.constant 0 : i32
      %77 = tpu.memref_slice %arg2[%76, %c0_i32_60] : memref<512x128xf32, #tpu.memory_space<any>> -> memref<1x128xf32, #tpu.memory_space<any>>
      %c1_i32_61 = arith.constant 1 : i32
      %c0_i32_62 = arith.constant 0 : i32
      %78 = tpu.memref_slice %arg12[%c1_i32_61, %c0_i32_62] : memref<8x128xf32, #tpu.memory_space<vmem>> -> memref<1x128xf32, #tpu.memory_space<vmem>>
      %79 = tpu.memref_slice %arg15[%c1_i32_59] : memref<8x!tpu.dma_semaphore, #tpu.memory_space<semaphore_mem>> -> memref<1x!tpu.dma_semaphore, #tpu.memory_space<semaphore_mem>>
      %80 = tpu.memref_squeeze %79 : memref<1x!tpu.dma_semaphore, #tpu.memory_space<semaphore_mem>> -> memref<!tpu.dma_semaphore, #tpu.memory_space<semaphore_mem>>
      tpu.wait_dma2 semaphore(%80 : memref<!tpu.dma_semaphore, #tpu.memory_space<semaphore_mem>>) src(%77 : memref<1x128xf32, #tpu.memory_space<any>>) dst(%78 : memref<1x128xf32, #tpu.memory_space<vmem>>)
      %c2_63 = arith.constant 2 : index
      %81 = memref.load %arg1[%c2_63] : memref<8xi32, #tpu.memory_space<smem>>
      %c0_i32_64 = arith.constant 0 : i32
      %c511_i32_65 = arith.constant 511 : i32
      %82 = arith.maxsi %c0_i32_64, %81 : i32
      %83 = arith.minsi %c511_i32_65, %82 : i32
      %c2_i32_66 = arith.constant 2 : i32
      %c0_i32_67 = arith.constant 0 : i32
      %84 = tpu.memref_slice %arg2[%83, %c0_i32_67] : memref<512x128xf32, #tpu.memory_space<any>> -> memref<1x128xf32, #tpu.memory_space<any>>
      %c2_i32_68 = arith.constant 2 : i32
      %c0_i32_69 = arith.constant 0 : i32
      %85 = tpu.memref_slice %arg12[%c2_i32_68, %c0_i32_69] : memref<8x128xf32, #tpu.memory_space<vmem>> -> memref<1x128xf32, #tpu.memory_space<vmem>>
      %86 = tpu.memref_slice %arg15[%c2_i32_66] : memref<8x!tpu.dma_semaphore, #tpu.memory_space<semaphore_mem>> -> memref<1x!tpu.dma_semaphore, #tpu.memory_space<semaphore_mem>>
      %87 = tpu.memref_squeeze %86 : memref<1x!tpu.dma_semaphore, #tpu.memory_space<semaphore_mem>> -> memref<!tpu.dma_semaphore, #tpu.memory_space<semaphore_mem>>
      tpu.wait_dma2 semaphore(%87 : memref<!tpu.dma_semaphore, #tpu.memory_space<semaphore_mem>>) src(%84 : memref<1x128xf32, #tpu.memory_space<any>>) dst(%85 : memref<1x128xf32, #tpu.memory_space<vmem>>)
      %c3_70 = arith.constant 3 : index
      %88 = memref.load %arg1[%c3_70] : memref<8xi32, #tpu.memory_space<smem>>
      %c0_i32_71 = arith.constant 0 : i32
      %c511_i32_72 = arith.constant 511 : i32
      %89 = arith.maxsi %c0_i32_71, %88 : i32
      %90 = arith.minsi %c511_i32_72, %89 : i32
      %c3_i32_73 = arith.constant 3 : i32
      %c0_i32_74 = arith.constant 0 : i32
      %91 = tpu.memref_slice %arg2[%90, %c0_i32_74] : memref<512x128xf32, #tpu.memory_space<any>> -> memref<1x128xf32, #tpu.memory_space<any>>
      %c3_i32_75 = arith.constant 3 : i32
      %c0_i32_76 = arith.constant 0 : i32
      %92 = tpu.memref_slice %arg12[%c3_i32_75, %c0_i32_76] : memref<8x128xf32, #tpu.memory_space<vmem>> -> memref<1x128xf32, #tpu.memory_space<vmem>>
      %93 = tpu.memref_slice %arg15[%c3_i32_73] : memref<8x!tpu.dma_semaphore, #tpu.memory_space<semaphore_mem>> -> memref<1x!tpu.dma_semaphore, #tpu.memory_space<semaphore_mem>>
      %94 = tpu.memref_squeeze %93 : memref<1x!tpu.dma_semaphore, #tpu.memory_space<semaphore_mem>> -> memref<!tpu.dma_semaphore, #tpu.memory_space<semaphore_mem>>
      tpu.wait_dma2 semaphore(%94 : memref<!tpu.dma_semaphore, #tpu.memory_space<semaphore_mem>>) src(%91 : memref<1x128xf32, #tpu.memory_space<any>>) dst(%92 : memref<1x128xf32, #tpu.memory_space<vmem>>)
      %c4_77 = arith.constant 4 : index
      %95 = memref.load %arg1[%c4_77] : memref<8xi32, #tpu.memory_space<smem>>
      %c0_i32_78 = arith.constant 0 : i32
      %c511_i32_79 = arith.constant 511 : i32
      %96 = arith.maxsi %c0_i32_78, %95 : i32
      %97 = arith.minsi %c511_i32_79, %96 : i32
      %c4_i32_80 = arith.constant 4 : i32
      %c0_i32_81 = arith.constant 0 : i32
      %98 = tpu.memref_slice %arg2[%97, %c0_i32_81] : memref<512x128xf32, #tpu.memory_space<any>> -> memref<1x128xf32, #tpu.memory_space<any>>
      %c4_i32_82 = arith.constant 4 : i32
      %c0_i32_83 = arith.constant 0 : i32
      %99 = tpu.memref_slice %arg12[%c4_i32_82, %c0_i32_83] : memref<8x128xf32, #tpu.memory_space<vmem>> -> memref<1x128xf32, #tpu.memory_space<vmem>>
      %100 = tpu.memref_slice %arg15[%c4_i32_80] : memref<8x!tpu.dma_semaphore, #tpu.memory_space<semaphore_mem>> -> memref<1x!tpu.dma_semaphore, #tpu.memory_space<semaphore_mem>>
      %101 = tpu.memref_squeeze %100 : memref<1x!tpu.dma_semaphore, #tpu.memory_space<semaphore_mem>> -> memref<!tpu.dma_semaphore, #tpu.memory_space<semaphore_mem>>
      tpu.wait_dma2 semaphore(%101 : memref<!tpu.dma_semaphore, #tpu.memory_space<semaphore_mem>>) src(%98 : memref<1x128xf32, #tpu.memory_space<any>>) dst(%99 : memref<1x128xf32, #tpu.memory_space<vmem>>)
      %c5_84 = arith.constant 5 : index
      %102 = memref.load %arg1[%c5_84] : memref<8xi32, #tpu.memory_space<smem>>
      %c0_i32_85 = arith.constant 0 : i32
      %c511_i32_86 = arith.constant 511 : i32
      %103 = arith.maxsi %c0_i32_85, %102 : i32
      %104 = arith.minsi %c511_i32_86, %103 : i32
      %c5_i32_87 = arith.constant 5 : i32
      %c0_i32_88 = arith.constant 0 : i32
      %105 = tpu.memref_slice %arg2[%104, %c0_i32_88] : memref<512x128xf32, #tpu.memory_space<any>> -> memref<1x128xf32, #tpu.memory_space<any>>
      %c5_i32_89 = arith.constant 5 : i32
      %c0_i32_90 = arith.constant 0 : i32
      %106 = tpu.memref_slice %arg12[%c5_i32_89, %c0_i32_90] : memref<8x128xf32, #tpu.memory_space<vmem>> -> memref<1x128xf32, #tpu.memory_space<vmem>>
      %107 = tpu.memref_slice %arg15[%c5_i32_87] : memref<8x!tpu.dma_semaphore, #tpu.memory_space<semaphore_mem>> -> memref<1x!tpu.dma_semaphore, #tpu.memory_space<semaphore_mem>>
      %108 = tpu.memref_squeeze %107 : memref<1x!tpu.dma_semaphore, #tpu.memory_space<semaphore_mem>> -> memref<!tpu.dma_semaphore, #tpu.memory_space<semaphore_mem>>
      tpu.wait_dma2 semaphore(%108 : memref<!tpu.dma_semaphore, #tpu.memory_space<semaphore_mem>>) src(%105 : memref<1x128xf32, #tpu.memory_space<any>>) dst(%106 : memref<1x128xf32, #tpu.memory_space<vmem>>)
      %c6_91 = arith.constant 6 : index
      %109 = memref.load %arg1[%c6_91] : memref<8xi32, #tpu.memory_space<smem>>
      %c0_i32_92 = arith.constant 0 : i32
      %c511_i32_93 = arith.constant 511 : i32
      %110 = arith.maxsi %c0_i32_92, %109 : i32
      %111 = arith.minsi %c511_i32_93, %110 : i32
      %c6_i32_94 = arith.constant 6 : i32
      %c0_i32_95 = arith.constant 0 : i32
      %112 = tpu.memref_slice %arg2[%111, %c0_i32_95] : memref<512x128xf32, #tpu.memory_space<any>> -> memref<1x128xf32, #tpu.memory_space<any>>
      %c6_i32_96 = arith.constant 6 : i32
      %c0_i32_97 = arith.constant 0 : i32
      %113 = tpu.memref_slice %arg12[%c6_i32_96, %c0_i32_97] : memref<8x128xf32, #tpu.memory_space<vmem>> -> memref<1x128xf32, #tpu.memory_space<vmem>>
      %114 = tpu.memref_slice %arg15[%c6_i32_94] : memref<8x!tpu.dma_semaphore, #tpu.memory_space<semaphore_mem>> -> memref<1x!tpu.dma_semaphore, #tpu.memory_space<semaphore_mem>>
      %115 = tpu.memref_squeeze %114 : memref<1x!tpu.dma_semaphore, #tpu.memory_space<semaphore_mem>> -> memref<!tpu.dma_semaphore, #tpu.memory_space<semaphore_mem>>
      tpu.wait_dma2 semaphore(%115 : memref<!tpu.dma_semaphore, #tpu.memory_space<semaphore_mem>>) src(%112 : memref<1x128xf32, #tpu.memory_space<any>>) dst(%113 : memref<1x128xf32, #tpu.memory_space<vmem>>)
      %c7_98 = arith.constant 7 : index
      %116 = memref.load %arg1[%c7_98] : memref<8xi32, #tpu.memory_space<smem>>
      %c0_i32_99 = arith.constant 0 : i32
      %c511_i32_100 = arith.constant 511 : i32
      %117 = arith.maxsi %c0_i32_99, %116 : i32
      %118 = arith.minsi %c511_i32_100, %117 : i32
      %c7_i32_101 = arith.constant 7 : i32
      %c0_i32_102 = arith.constant 0 : i32
      %119 = tpu.memref_slice %arg2[%118, %c0_i32_102] : memref<512x128xf32, #tpu.memory_space<any>> -> memref<1x128xf32, #tpu.memory_space<any>>
      %c7_i32_103 = arith.constant 7 : i32
      %c0_i32_104 = arith.constant 0 : i32
      %120 = tpu.memref_slice %arg12[%c7_i32_103, %c0_i32_104] : memref<8x128xf32, #tpu.memory_space<vmem>> -> memref<1x128xf32, #tpu.memory_space<vmem>>
      %121 = tpu.memref_slice %arg15[%c7_i32_101] : memref<8x!tpu.dma_semaphore, #tpu.memory_space<semaphore_mem>> -> memref<1x!tpu.dma_semaphore, #tpu.memory_space<semaphore_mem>>
      %122 = tpu.memref_squeeze %121 : memref<1x!tpu.dma_semaphore, #tpu.memory_space<semaphore_mem>> -> memref<!tpu.dma_semaphore, #tpu.memory_space<semaphore_mem>>
      tpu.wait_dma2 semaphore(%122 : memref<!tpu.dma_semaphore, #tpu.memory_space<semaphore_mem>>) src(%119 : memref<1x128xf32, #tpu.memory_space<any>>) dst(%120 : memref<1x128xf32, #tpu.memory_space<vmem>>)
      %c0_105 = arith.constant 0 : index
      %c0_106 = arith.constant 0 : index
      %123 = vector.load %arg12[%c0_105, %c0_106] : memref<8x128xf32, #tpu.memory_space<vmem>>, vector<8x128xf32>
      %124 = arith.truncf %123 : vector<8x128xf32> to vector<8x128xbf16>
      %c0_107 = arith.constant 0 : index
      %c0_108 = arith.constant 0 : index
      %125 = vector.load %arg3[%c0_107, %c0_108] : memref<8x128xf32, #tpu.memory_space<vmem>>, vector<8x128xf32>
      %126 = arith.truncf %125 : vector<8x128xf32> to vector<8x128xbf16>
      %127 = tpu.concatenate %124, %126 in 1 : vector<8x128xbf16>, vector<8x128xbf16> -> vector<8x256xbf16>
      %c0_109 = arith.constant 0 : index
      %c0_110 = arith.constant 0 : index
      %128 = vector.load %arg5[%c0_109, %c0_110] : memref<256x512xbf16, #tpu.memory_space<vmem>>, vector<256x512xbf16>
      %cst_111 = arith.constant dense<0.000000e+00> : vector<8x512xf32>
      %129 = tpu.matmul %127, %128, %cst_111 {dimension_numbers = #tpu.dot_dimension_numbers<[1], [0], [0], [1], [0, 0, 1, 1], [], []>} : vector<8x256xbf16>, vector<256x512xbf16>, vector<8x512xf32> -> vector<8x512xf32>
      %c0_112 = arith.constant 0 : index
      %c0_113 = arith.constant 0 : index
      %130 = vector.load %arg6[%c0_112, %c0_113] : memref<1x512xf32, #tpu.memory_space<vmem>>, vector<1x512xf32>
      %131 = vector.broadcast %130 : vector<1x512xf32> to vector<8x512xf32>
      %132 = arith.addf %129, %131 : vector<8x512xf32>
      %133 = vector.extract_strided_slice %132 {offsets = [0, 0], sizes = [8, 128], strides = [1, 1]} : vector<8x512xf32> to vector<8x128xf32>
      %134 = arith.negf %133 : vector<8x128xf32>
      %135 = math.exp %134 : vector<8x128xf32>
      %cst_114 = arith.constant 1.000000e+00 : f32
      %136 = vector.broadcast %cst_114 : f32 to vector<8x128xf32>
      %137 = arith.addf %136, %135 : vector<8x128xf32>
      %138 = arith.divf %136, %137 : vector<8x128xf32>
      %139 = vector.extract_strided_slice %132 {offsets = [0, 128], sizes = [8, 128], strides = [1, 1]} : vector<8x512xf32> to vector<8x128xf32>
      %140 = arith.negf %139 : vector<8x128xf32>
      %141 = math.exp %140 : vector<8x128xf32>
      %cst_115 = arith.constant 1.000000e+00 : f32
      %142 = vector.broadcast %cst_115 : f32 to vector<8x128xf32>
      %143 = arith.addf %142, %141 : vector<8x128xf32>
      %144 = arith.divf %142, %143 : vector<8x128xf32>
      %145 = vector.extract_strided_slice %132 {offsets = [0, 256], sizes = [8, 128], strides = [1, 1]} : vector<8x512xf32> to vector<8x128xf32>
      %146 = math.tanh %145 : vector<8x128xf32>
      %147 = vector.extract_strided_slice %132 {offsets = [0, 384], sizes = [8, 128], strides = [1, 1]} : vector<8x512xf32> to vector<8x128xf32>
      %148 = arith.negf %147 : vector<8x128xf32>
      %149 = math.exp %148 : vector<8x128xf32>
      %cst_116 = arith.constant 1.000000e+00 : f32
      %150 = vector.broadcast %cst_116 : f32 to vector<8x128xf32>
      %151 = arith.addf %150, %149 : vector<8x128xf32>
      %152 = arith.divf %150, %151 : vector<8x128xf32>
      %c0_117 = arith.constant 0 : index
      %c0_118 = arith.constant 0 : index
      %153 = vector.load %arg4[%c0_117, %c0_118] : memref<8x128xf32, #tpu.memory_space<vmem>>, vector<8x128xf32>
      %154 = arith.mulf %144, %153 : vector<8x128xf32>
      %155 = arith.mulf %138, %146 : vector<8x128xf32>
      %156 = arith.addf %154, %155 : vector<8x128xf32>
      %157 = math.tanh %156 : vector<8x128xf32>
      %158 = arith.mulf %152, %157 : vector<8x128xf32>
      %c0_119 = arith.constant 0 : index
      %c0_120 = arith.constant 0 : index
      %159 = vector.load %arg13[%c0_119, %c0_120] : memref<8x128xf32, #tpu.memory_space<vmem>>, vector<8x128xf32>
      tpu.vector_store %arg13[%c0_119, %c0_120], %158 {strides = array<i32>} : memref<8x128xf32, #tpu.memory_space<vmem>>, vector<8x128xf32>,
      %c0_121 = arith.constant 0 : index
      %c0_122 = arith.constant 0 : index
      %160 = vector.load %arg14[%c0_121, %c0_122] : memref<8x128xf32, #tpu.memory_space<vmem>>, vector<8x128xf32>
      tpu.vector_store %arg14[%c0_121, %c0_122], %156 {strides = array<i32>} : memref<8x128xf32, #tpu.memory_space<vmem>>, vector<8x128xf32>,
      %c0_123 = arith.constant 0 : index
      %c0_124 = arith.constant 0 : index
      %161 = vector.load %arg10[%c0_123, %c0_124] : memref<8x128xf32, #tpu.memory_space<vmem>>, vector<8x128xf32>
      tpu.vector_store %arg10[%c0_123, %c0_124], %158 {strides = array<i32>} : memref<8x128xf32, #tpu.memory_space<vmem>>, vector<8x128xf32>,
      %c0_125 = arith.constant 0 : index
      %c0_126 = arith.constant 0 : index
      %162 = vector.load %arg11[%c0_125, %c0_126] : memref<8x128xf32, #tpu.memory_space<vmem>>, vector<8x128xf32>
      tpu.vector_store %arg11[%c0_125, %c0_126], %156 {strides = array<i32>} : memref<8x128xf32, #tpu.memory_space<vmem>>, vector<8x128xf32>,
    } else {
    }
    %c0 = arith.constant 0 : index
    %c0_1 = arith.constant 0 : index
    %3 = vector.load %arg13[%c0, %c0_1] : memref<8x128xf32, #tpu.memory_space<vmem>>, vector<8x128xf32>
    %4 = arith.truncf %3 : vector<8x128xf32> to vector<8x128xbf16>
    %c0_2 = arith.constant 0 : index
    %c0_3 = arith.constant 0 : index
    %5 = vector.load %arg7[%c0_2, %c0_3] : memref<128x256xbf16, #tpu.memory_space<vmem>>, vector<128x256xbf16>
    %cst = arith.constant dense<0.000000e+00> : vector<8x256xf32>
    %6 = tpu.matmul %4, %5, %cst {dimension_numbers = #tpu.dot_dimension_numbers<[1], [0], [0], [1], [0, 0, 1, 1], [], []>} : vector<8x128xbf16>, vector<128x256xbf16>, vector<8x256xf32> -> vector<8x256xf32>
    %c0_4 = arith.constant 0 : index
    %c0_5 = arith.constant 0 : index
    %7 = vector.load %arg8[%c0_4, %c0_5] : memref<1x256xf32, #tpu.memory_space<vmem>>, vector<1x256xf32>
    %8 = vector.broadcast %7 : vector<1x256xf32> to vector<8x256xf32>
    %9 = arith.addf %6, %8 : vector<8x256xf32>
    %c0_6 = arith.constant 0 : index
    %c0_7 = arith.constant 0 : index
    %10 = vector.load %arg9[%c0_6, %c0_7] : memref<8x256xf32, #tpu.memory_space<vmem>>, vector<8x256xf32>
    tpu.vector_store %arg9[%c0_6, %c0_7], %9 {strides = array<i32>} : memref<8x256xf32, #tpu.memory_space<vmem>>, vector<8x256xf32>,
    return
  }
  func.func @transform_1(%arg0: i32, %arg1: memref<8xi32, #tpu.memory_space<smem>>) -> (i32, i32) {
    %c0_i32 = arith.constant 0 : i32
    %c0_i32_0 = arith.constant 0 : i32
    %c0_i32_1 = arith.constant 0 : i32
    return %c0_i32, %c0_i32_0 : i32, i32
  }
  func.func @transform_2(%arg0: i32, %arg1: memref<8xi32, #tpu.memory_space<smem>>) -> (i32, i32) {
    %c0_i32 = arith.constant 0 : i32
    %c0_i32_0 = arith.constant 0 : i32
    %c0_i32_1 = arith.constant 0 : i32
    return %c0_i32, %c0_i32_0 : i32, i32
  }
  func.func @transform_3(%arg0: i32, %arg1: memref<8xi32, #tpu.memory_space<smem>>) -> (i32, i32) {
    %c0_i32 = arith.constant 0 : i32
    %c0_i32_0 = arith.constant 0 : i32
    %c0_i32_1 = arith.constant 0 : i32
    return %c0_i32, %c0_i32_0 : i32, i32
  }
  func.func @transform_4(%arg0: i32, %arg1: memref<8xi32, #tpu.memory_space<smem>>) -> (i32, i32) {
    %c0_i32 = arith.constant 0 : i32
    %c0_i32_0 = arith.constant 0 : i32
    %c0_i32_1 = arith.constant 0 : i32
    return %c0_i32, %c0_i32_0 : i32, i32
  }
  func.func @transform_5(%arg0: i32, %arg1: memref<8xi32, #tpu.memory_space<smem>>) -> (i32, i32) {
    %c0_i32 = arith.constant 0 : i32
    %c0_i32_0 = arith.constant 0 : i32
    return %c0_i32, %arg0 : i32, i32
  }
  func.func @transform_6(%arg0: i32, %arg1: memref<8xi32, #tpu.memory_space<smem>>) -> (i32, i32) {
    %c0_i32 = arith.constant 0 : i32
    %c0_i32_0 = arith.constant 0 : i32
    return %c0_i32, %arg0 : i32, i32
  }
  func.func @transform_7(%arg0: i32, %arg1: memref<8xi32, #tpu.memory_space<smem>>) -> (i32, i32) {
    %c0_i32 = arith.constant 0 : i32
    %c0_i32_0 = arith.constant 0 : i32
    return %c0_i32, %arg0 : i32, i32
  }
  func.func @transform_8(%arg0: i32, %arg1: memref<8xi32, #tpu.memory_space<smem>>) -> (i32, i32) {
    %c0_i32 = arith.constant 0 : i32
    %c0_i32_0 = arith.constant 0 : i32
    %c0_i32_1 = arith.constant 0 : i32
    return %c0_i32, %c0_i32_0 : i32, i32
  }
  func.func @transform_9(%arg0: i32, %arg1: memref<8xi32, #tpu.memory_space<smem>>) -> (i32, i32) {
    %c0_i32 = arith.constant 0 : i32
    %c0_i32_0 = arith.constant 0 : i32
    %c0_i32_1 = arith.constant 0 : i32
    return %c0_i32, %c0_i32_0 : i32, i32
  }
}

</mosaic_0001>

<bundles_post_ra>
// kernel: tpu_custom_call.1
= control target key start
LH: loop header
LB: loop body
LE: loop exit
PB: predicated region body
PF: predicated region fallthrough
CT: control target
= control target key end

     0   :  { %s2699_s16 = smov [#allocation7]   ;;  %s3165_s0 = inlined_call_operand.hbm [shape: s32[8], index: 0, kind: input, shape index: {}]   ;;  %s3166_s1 = inlined_call_operand.hbm [shape: f32[512,128], index: 1, kind: input, shape index: {}]   ;;  %s3167_s2 = inlined_call_operand.hbm [shape: f32[8,128], index: 2, kind: input, shape index: {}]   ;;  %s3168_s3 = inlined_call_operand.hbm [shape: f32[8,128], index: 3, kind: input, shape index: {}]   ;;  %s3169_s4 = inlined_call_operand.hbm [shape: bf16[256,512], index: 4, kind: input, shape index: {}]   ;;  %s3170_s5 = inlined_call_operand.vmem [shape: f32[1,512], index: 5, kind: input, shape index: {}]   ;;  %s3171_s6 = inlined_call_operand.hbm [shape: bf16[128,512], index: 6, kind: input, shape index: {}]   ;;  %s3172_s7 = inlined_call_operand.hbm [shape: f32[1,512], index: 7, kind: input, shape index: {}]   ;;  %s3173_s8 = inlined_call_operand.hbm [shape: f32[8,512], index: 8, kind: output, shape index: {0}]   ;;  %s3174_s9 = inlined_call_operand.hbm [shape: f32[8,128], index: 9, kind: output, shape index: {1}]   ;;  %s3175_s10 = inlined_call_operand.hbm [shape: f32[8,128], index: 10, kind: output, shape index: {2}]  }
   0x1   :  { %3188 = sst [smem:[#allocation60_spill]] %s3167_s2  ;;  %s17_s15 = sshll.u32 %s3165_s0, 4  ;;  %s18_s15 = int_to_ptr.hbm [resolvable:$true] %s17_s15 }
   0x2   :  { %3189 = sst [smem:[#allocation61_spill]] %s3168_s3 }
   0x3   :  { %3190 = sst [smem:[#allocation62_spill]] %s3169_s4 }
   0x4   :  { %3191 = sst [smem:[#allocation63_spill]] %s3171_s6 }
   0x5   :  { %3192 = sst [smem:[#allocation64_spill]] %s3172_s7 }
   0x6   :  { %3193 = sst [smem:[#allocation65_spill]] %s3173_s8 }
   0x7   :  { %20 = dma.hbm_to_smem %s18_s15, 16, %s2699_s16, [#allocation6] }
   0x8   :  { %2645 = dma.done.wait [#allocation6], 16 }
   0x9   :  { %2646 = vsyncadd [#allocation6], 4294967280 }
   0xa   :  { %23 = sfence }
   0xb   :  { %24 = vsyncpa [#allocation9], 0 }
   0xc   :  { %25 = vsyncpa [#allocation12], 0 }
   0xd   :  { %26 = vsyncpa [#allocation15], 0 }
   0xe   :  { %28 = vsyncpa [#allocation15 + $0x1], 0 }
   0xf   :  { %29 = vsyncpa [#allocation10], 0 }
  0x10   :  { %31 = vsyncpa [#allocation10 + $0x1], 0 }
  0x11   :  { %32 = vsyncpa [#allocation19], 0  ;;  %s2775_s17 = smov 0   ;;  %s2777_s18 = smov 0  }
  0x12   :  { %s2779_s19 = smov 0   ;;  %s2781_s0 = smov 0  }
  0x13 LB: > { %3194 = sst [smem:[#allocation53_spill]] %s2685_s17  ;;  %s2796_s20 = sadd.s32 4294967295, %s2697_s0   ;;  %s2697_s0 = sphi %s2781_s0, %s3234_s0   ;;  %s2693_s19 = sphi %s2779_s19, %s3238_s19   ;;  %s2689_s18 = sphi %s2777_s18, %s3237_s18   ;;  %s2685_s17 = sphi %s2775_s17, %s3236_s17  }
  0x14   : > { %s1562_s21 = sadd.s32 4294967294, %s2697_s0   ;;  %s2800_s22 = sadd.s32 1, %s2697_s0  }
  0x15   : > { %3195 = sst [smem:[#allocation54_spill]] %s2800_s22  ;;  %s129_s23 = sadd.s32 1, %s2693_s19 }
  0x16   : > { %s126_s24 = ssub.s32 %s2697_s0, %s2800_s22  ;;  %p136_p0 = scmp.ne.s32.totalorder %s2693_s19, %s2689_s18 }
  0x17   : > { %p127_p1 = scmp.eq.s32.totalorder %s126_s24, 0  ;;  %p137_p2 = scmp.eq.s32.totalorder %s2697_s0, 0 }
  0x18   : > { %p142_p3 = scmp.ne.s32.totalorder %s2689_s18, %s2685_s17  ;;  %p3182_p4 = scmp.eq.s32.totalorder %s2796_s20, 0 }
  0x19   : > { %s2812_s25 = scalar_select %p127_p1, %s2693_s19, %s129_s23  }
  0x1a   : > { %p2814_p5 = por %p137_p2, %p136_p0  ;;  %p2820_p6 = por %p3182_p4, %p142_p3 }
  0x1b   : > { %3196 = sst [smem:[#allocation55_spill]] %s2812_s25  ;;  %p3181_p7 = scmp.eq.s32.totalorder %s2796_s20, 1 }
  0x1c   : > { %p198_p8 = scmp.eq.s32.totalorder %s1562_s21, 1  ;;  %p1563_p9 = scmp.ge.s32.totalorder %s2697_s0, 1 }
  0x1d   : > { %p247_p10 = scmp.lt.s32.totalorder %s2697_s0, 3  ;;  %p2829_p11 = por %p3181_p7, %p136_p0 }
  0x1e   : > { %p2833_p12 = por %p198_p8, %p142_p3  ;;  %s3204_s3 = sld [smem:[#allocation61_spill]] }
  0x1f   : > { %s3199_s28 = scalar_select %p2829_p11, 1, 0 }
  0x20   : > { %s3201_s29 = scalar_select %p2833_p12, 1, 0 }
  0x21   : > { %3200 = sst [smem:[#allocation56_spill]] %s3199_s28  ;;  %p2837_p13 = pnand %p1563_p9, %p247_p10 }
  0x22   : > { %3202 = sst [smem:[#allocation57_spill]] %s3201_s29  ;;  %s2700_s14 = smov [#allocation11]  }
  0x23   : > { %p2092_p0 = pneg %p2837_p13  ;;  %s273_s15 = sshll.u32 %s2700_s14, 4  ;;  %s274_s15 = int_to_ptr.vmem [resolvable:$true] %s273_s15 }
  0x24   : > { %s271_s13 = sshll.u32 %s3204_s3, 4  ;;  %p2116_p8 = scmp.lt.s32.totalorder %s2697_s0, 2  ;;  %s272_s13 = int_to_ptr.hbm [resolvable:$true] %s271_s13 }
  0x25   : > { %p2850_p3 = pnand %p2092_p0, %p3182_p4  ;;  %s301_s21 = sand.u32 1, %s2697_s0  }
  0x26   : > { %p2860_p9 = pnand %p2116_p8, %p2814_p5  ;;  %s3180_s24 = sand.u32 1, %s2693_s19  }
  0x27   : > { %2098 = dma.hbm_to_vmem [thread:$0]  (!%p2850_p3), %s272_s13, 128, %s274_s15, [#allocation12]  }
  0x28   : > { %s1968_s11 = sshll.u32 %s2697_s0, 3  ;;  %s1568_s12 = sshll.u32 %s3180_s24, 7 }
  0x29   : > { %s3207_s6 = sld [smem:[#allocation63_spill]]  ;;  %s305_s29 = scalar_lea.vmem [#allocation14], %s1568_s12 }
  0x2a   : > { %s313_s17 = sshll.u32 %s305_s29, 4  ;;  %s2871_s26 = scalar_lea.sflag [#allocation15], %s301_s21  ;;  %s314_s17 = int_to_ptr.vmem [resolvable:$true] %s313_s17 }
  0x2b   : > { %p2237_p10 = pneg %p2860_p9 }
  0x2f   : > { %s310_s25 = scalar_lea.hbm %s3207_s6, %s1968_s11 }
  0x30   : > { %s311_s22 = sshll.u32 %s310_s25, 4  ;;  %s2240_s25 = scalar_lea.hbm %s3207_s6, 256  ;;  %s312_s22 = int_to_ptr.hbm [resolvable:$true] %s311_s22 }
  0x31   : > { %s2233_s13 = sshra.s32 %s312_s22, 4  ;;  %s2234_s13 = int_to_ptr.hbm [resolvable:$true] %s2233_s13 }
  0x32   : > { %s2235_s15 = scalar_lea.hbm %s2234_s13, 128  ;;  %p2241_p2 = scmp.lt.s32.totalorder %s2234_s13, %s3207_s6 }
  0x33   : > { %p2236_p5 = scmp.ne.s32.totalorder %s2234_s13, %s2235_s15  ;;  %p2242_p7 = scmp.lt.s32.totalorder %s2240_s25, %s2235_s15 }
  0x35   : > { %p2238_p0 = pnand %p2237_p10, %p2236_p5  ;;  %p2243_p1 = por %p2242_p7, %p2241_p2 }
  0x37   : > { %p2239_p8 = pneg %p2238_p0 }
  0x39   : > { %p2244_p4 = pnand %p2243_p1, %p2239_p8 }
  0x3b   : > { %2247 = shalt.err (!%p2244_p4)
}
  0x3c   : > { %s2701_s21 = smov 256   ;;  %s2702_s12 = smov 128  }
  0x3d   : > { %s2703_s14 = smov 8   ;;  %s3208_s2 = sld [smem:[#allocation60_spill]] }
  0x3e   : > { %2105 = dma.hbm_to_vmem [thread:$0]  (!%p2860_p9), %s312_s22, 2048, %s314_s17, %s2871_s26, %s2701_s21, %s2702_s12, %s2703_s14  }
  0x3f   : > { %s2704_s13 = smov [#allocation8]   ;;  %s3209_s4 = sld [smem:[#allocation62_spill]] }
  0x40   : > { %s261_s15 = sshll.u32 %s2704_s13, 4  ;;  %s2705_s28 = smov [#allocation13]   ;;  %s262_s15 = int_to_ptr.vmem [resolvable:$true] %s261_s15 }
  0x41   : > { %s284_s8 = sshll.u32 %s2705_s28, 4  ;;  %s3210_s17 = sand.u32 1, %s2693_s19   ;;  %s285_s8 = int_to_ptr.vmem [resolvable:$true] %s284_s8 }
  0x42   : > { %s1571_s22 = sshll.u32 %s3210_s17, 1  ;;  %s2706_s12 = smov 16  }
  0x43   : > { %s259_s11 = sshll.u32 %s3208_s2, 4  ;;  %s1572_s14 = sshll.u32 %s2697_s0, 1  ;;  %s260_s11 = int_to_ptr.hbm [resolvable:$true] %s259_s11 }
  0x44   : > { %2095 = dma.hbm_to_vmem [thread:$0]  (!%p2850_p3), %s260_s11, 128, %s262_s15, [#allocation9]  }
  0x45   : > { %s282_s6 = sshll.u32 %s3209_s4, 4  ;;  %s3211_s7 = sld [smem:[#allocation64_spill]]  ;;  %s283_s6 = int_to_ptr.hbm [resolvable:$true] %s282_s6 }
  0x46   : > { %2101 = dma.hbm_to_vmem [thread:$0]  (!%p2850_p3), %s283_s6, 8192, %s285_s8, [#allocation12], %s2701_s21, %s2701_s21, %s2706_s12  }
  0x47   : > { %s327_s2 = scalar_lea.vmem [#allocation16], %s1571_s22 }
  0x48   : > { %s335_s25 = sshll.u32 %s327_s2, 4  ;;  %s336_s25 = int_to_ptr.vmem [resolvable:$true] %s335_s25 }
  0x4b   : > { %s331_s13 = scalar_lea.hbm %s3211_s7, %s1572_s14  ;;  %s2330_s8 = scalar_lea.hbm %s3211_s7, 4 }
  0x4c   : > { %s333_s29 = sshll.u32 %s331_s13, 4  ;;  %s334_s29 = int_to_ptr.hbm [resolvable:$true] %s333_s29 }
  0x4d   : > { %s2323_s11 = sshra.s32 %s334_s29, 4  ;;  %s2324_s11 = int_to_ptr.hbm [resolvable:$true] %s2323_s11 }
  0x4e   : > { %s2325_s28 = scalar_lea.hbm %s2324_s11, 2  ;;  %p2331_p2 = scmp.lt.s32.totalorder %s2324_s11, %s3211_s7 }
  0x4f   : > { %p2326_p4 = scmp.ne.s32.totalorder %s2324_s11, %s2325_s28  ;;  %p2332_p3 = scmp.lt.s32.totalorder %s2330_s8, %s2325_s28 }
  0x51   : > { %p2328_p7 = pnand %p2326_p4, %p2237_p10  ;;  %p2333_p5 = por %p2332_p3, %p2331_p2 }
  0x53   : > { %p2329_p1 = pneg %p2328_p7 }
  0x55   : > { %p2334_p0 = pnand %p2333_p5, %p2329_p1 }
  0x57   : > { %2337 = shalt.err (!%p2334_p0)
}
  0x58   : > { %2108 = dma.hbm_to_vmem [thread:$0]  (!%p2860_p9), %s334_s29, 32, %s336_s25, %s2871_s26  }
  0x59   : > { %344 = sbr.rel (%p2837_p13) target bundleno = 657 (0x291), region = 44  ;;  %p3212_p10 = scmp.eq.s32.totalorder (!%p2837_p13), %s2796_s20, 0 }
  0x5e   : > { %2648 = dma.done.wait (%p3212_p10), [#allocation9], 128   ;;  %p3213_p8 = pmov %p3212_p10 }
  0x60   : > { %2650 = vsyncadd (%p3213_p8), [#allocation9], 4294967168  ;;  %p3214_p4 = pmov %p3213_p8 }
  0x62   : > { %2652 = dma.done.wait (%p3214_p4), [#allocation12], 8320   ;;  %p3215_p7 = pmov %p3214_p4 }
  0x63   : > { %s361_s2 = sand.u32 1, %s2796_s20   ;;  %s2927_s23 = sand.u32 1, %s2689_s18  }
  0x64   : > { %2654 = vsyncadd (%p3215_p7), [#allocation12], 4294958976  ;;  %s1577_s30 = sshll.u32 %s2927_s23, 7  ;;  %s362_s26 = scalar_lea.sflag [#allocation15], %s361_s2 }
  0x65   : > { %s2930_s17 = scalar_lea.vmem [#allocation14], %s1577_s30 }
  0x66   : > { %2656 = dma.done.wait (%p2820_p6), %s362_s26, 2080  }
  0x67   : > { %2658 = vsyncadd (%p2820_p6), %s362_s26, 4294965216  ;;  %s1578_s22 = sshll.u32 %s2927_s23, 1  ;;  %s1579_s12 = sshll.u32 %s2927_s23, 4 }
  0x68   : > { %s2938_s14 = scalar_lea.vmem [#allocation16], %s1578_s22  ;;  %s2940_s24 = scalar_lea.vmem [#allocation17], %s1579_s12 }
  0x69   : > { %p3216_p13 = scmp.ne.s32.totalorder %s2796_s20, 0 }
  0x6b   : > { %420 = sbr.rel (%p3216_p13) target bundleno = 485 (0x1e5), region = 68 }
  0x70   : > { %s421_s3 = sld [smem:[#allocation7]]  ;;  %s2707_s13 = smov [#allocation2]  }
  0x71   : > { %s2944_s25 = sshll.u32 %s2707_s13, 4  ;;  %s1586_s29 = sld [smem:[#allocation7 + $0x1]] }
  0x72   : > { %3217 = sst [smem:[#allocation58_spill]] %s2944_s25  ;;  %s2708_s27 = smov [#allocation2 + $0x1]  }
  0x73   : > { %s2947_s11 = sshll.u32 %s2708_s27, 4  ;;  %s2949_s28 = sld [smem:[#allocation7 + $0x2]] }
  0x74   : > { %3218 = sst [smem:[#allocation59_spill]] %s2947_s11  ;;  %s2709_s16 = smov [#allocation2 + $0x2]  }
  0x75   : > { %s2952_s6 = sshll.u32 %s2709_s16, 4  ;;  %s2954_s8 = sld [smem:[#allocation7 + $0x3]]  ;;  %s479_s6 = int_to_ptr.vmem [resolvable:$true] %s2952_s6 }
  0x76   : > { %p422_p6 = scmp.gt.s32.totalorder %s421_s3, 0  ;;  %p1581_p9 = scmp.lt.s32.totalorder %s421_s3, 511 }
  0x77   : > { %p441_p1 = scmp.gt.s32.totalorder %s1586_s29, 0  ;;  %p1587_p2 = scmp.lt.s32.totalorder %s1586_s29, 511 }
  0x78   : > { %s3240_s3 = smov (!%p422_p6, %s421_s3), 0  ;;  %s2966_s4 = scalar_lea.hbm %s3166_s1, 512 }
  0x79   : > { %s3242_s29 = smov (!%p441_p1, %s1586_s29), 0  ;;  %s3244_s3 = smov (!%p1581_p9, %s3240_s3), 511 }
  0x7a   : > { %s3246_s29 = smov (!%p1587_p2, %s3242_s29), 511  ;;  %s426_s2 = scalar_lea.hbm %s3166_s1, %s3244_s3 }
  0x7b   : > { %p462_p3 = scmp.gt.s32.totalorder %s2949_s28, 0  ;;  %s434_s30 = sshll.u32 %s426_s2, 4  ;;  %s435_s30 = int_to_ptr.hbm [resolvable:$true] %s434_s30 }
  0x7c   : > { %s445_s12 = scalar_lea.hbm %s3166_s1, %s3246_s29  ;;  %s2353_s27 = sshra.s32 %s435_s30, 4  ;;  %s2354_s27 = int_to_ptr.hbm [resolvable:$true] %s2353_s27 }
  0x7d   : > { %s455_s13 = sshll.u32 %s445_s12, 4  ;;  %s2355_s16 = scalar_lea.hbm %s2354_s27, 1  ;;  %s456_s13 = int_to_ptr.hbm [resolvable:$true] %s455_s13 }
  0x7e   : > { %p2356_p5 = scmp.ne.s32.totalorder %s2354_s27, %s2355_s16  ;;  %p2358_p0 = scmp.lt.s32.totalorder %s2354_s27, %s3166_s1 }
  0x7f   : > { %p2359_p10 = scmp.lt.s32.totalorder %s2966_s4, %s2355_s16 }
  0x81   : > { %p2360_p8 = por %p2359_p10, %p2358_p0 }
  0x83   : > { %p2361_p4 = pnand %p2360_p8, %p2356_p5 }
  0x85   : > { %2364 = shalt.err (!%p2361_p4)  }
  0x86   : > { %s3219_s3 = sld [smem:[#allocation58_spill]]  ;;  %p1593_p7 = scmp.lt.s32.totalorder %s2949_s28, 511 }
  0x87   : > { %s2377_s15 = sshra.s32 %s456_s13, 4  ;;  %s2378_s15 = int_to_ptr.hbm [resolvable:$true] %s2377_s15 }
  0x88   : > { %s2379_s25 = scalar_lea.hbm %s2378_s15, 1  ;;  %p2382_p6 = scmp.lt.s32.totalorder %s2378_s15, %s3166_s1 }
  0x89   : > { %p2380_p13 = scmp.ne.s32.totalorder %s2378_s15, %s2379_s25  ;;  %p2383_p9 = scmp.lt.s32.totalorder %s2966_s4, %s2379_s25 }
  0x8b   : > { %p2384_p1 = por %p2383_p9, %p2382_p6 }
  0x8c   : > { %s3220_s29 = int_to_ptr.vmem [resolvable:$true] %s3219_s3 }
  0x8d   : > { %439 = dma.hbm_to_vmem [thread:$0]  %s435_s30, 16, %s3220_s29, [#allocation5] }
  0x8e   : > { %p2385_p2 = pnand %p2384_p1, %p2380_p13 }
  0x90   : > { %2388 = shalt.err (!%p2385_p2)  }
  0x91   : > { %s3221_s7 = sld [smem:[#allocation59_spill]]  ;;  %p483_p5 = scmp.gt.s32.totalorder %s2954_s8, 0 }
  0x92   : > { %s463_s30 = scalar_select %p462_p3, %s2949_s28, 0 }
  0x93   : > { %s484_s22 = scalar_select %p483_p5, %s2954_s8, 0 }
  0x94   : > { %s3248_s30 = smov (!%p1593_p7, %s463_s30), 511  ;;  %p1599_p0 = scmp.lt.s32.totalorder %s2954_s8, 511 }
  0x95   : > { %s466_s16 = scalar_lea.hbm %s3166_s1, %s3248_s30  ;;  %s2710_s3 = smov [#allocation2 + $0x3]  }
  0x96   : > { %s476_s21 = sshll.u32 %s466_s16, 4  ;;  %s2993_s29 = sshll.u32 %s2710_s3, 4  ;;  %s477_s21 = int_to_ptr.hbm [resolvable:$true] %s476_s21  ;;  %s500_s29 = int_to_ptr.vmem [resolvable:$true] %s2993_s29 }
  0x97   : > { %s3222_s26 = int_to_ptr.vmem [resolvable:$true] %s3221_s7  ;;  %s2401_s15 = sshra.s32 %s477_s21, 4  ;;  %s2402_s15 = int_to_ptr.hbm [resolvable:$true] %s2401_s15 }
  0x98   : > { %460 = dma.hbm_to_vmem [thread:$0]  %s456_s13, 16, %s3222_s26, [#allocation5 + $0x1] }
  0x99   : > { %s2403_s13 = scalar_lea.hbm %s2402_s15, 1  ;;  %p2406_p10 = scmp.lt.s32.totalorder %s2402_s15, %s3166_s1 }
  0x9a   : > { %p2404_p3 = scmp.ne.s32.totalorder %s2402_s15, %s2403_s13  ;;  %p2407_p8 = scmp.lt.s32.totalorder %s2966_s4, %s2403_s13 }
  0x9c   : > { %p2408_p4 = por %p2407_p8, %p2406_p10 }
  0x9e   : > { %p2409_p7 = pnand %p2408_p4, %p2404_p3 }
  0xa0   : > { %2412 = shalt.err (!%p2409_p7)  }
  0xa1   : > { %481 = dma.hbm_to_vmem [thread:$0]  %s477_s21, 16, %s479_s6, [#allocation5 + $0x2] }
  0xa2   : > { %s3250_s22 = smov (!%p1599_p0, %s484_s22), 511  ;;  %s1604_s28 = sld [smem:[#allocation7 + $0x4]] }
  0xa3   : > { %s487_s26 = scalar_lea.hbm %s3166_s1, %s3250_s22  ;;  %s2711_s12 = smov [#allocation2 + $0x4]  }
  0xa4   : > { %s497_s30 = sshll.u32 %s487_s26, 4  ;;  %s3005_s27 = sshll.u32 %s2711_s12, 4  ;;  %s498_s30 = int_to_ptr.hbm [resolvable:$true] %s497_s30  ;;  %s521_s27 = int_to_ptr.vmem [resolvable:$true] %s3005_s27 }
  0xa5   : > { %s2425_s16 = sshra.s32 %s498_s30, 4  ;;  %s2426_s16 = int_to_ptr.hbm [resolvable:$true] %s2425_s16 }
  0xa6   : > { %s2427_s6 = scalar_lea.hbm %s2426_s16, 1  ;;  %p2430_p6 = scmp.lt.s32.totalorder %s2426_s16, %s3166_s1 }
  0xa7   : > { %p2428_p13 = scmp.ne.s32.totalorder %s2426_s16, %s2427_s6  ;;  %p2431_p9 = scmp.lt.s32.totalorder %s2966_s4, %s2427_s6 }
  0xa9   : > { %p2432_p1 = por %p2431_p9, %p2430_p6 }
  0xab   : > { %p2433_p2 = pnand %p2432_p1, %p2428_p13 }
  0xad   : > { %2436 = shalt.err (!%p2433_p2)  }
  0xae   : > { %502 = dma.hbm_to_vmem [thread:$0]  %s498_s30, 16, %s500_s29, [#allocation5 + $0x3] }
  0xaf   : > { %s3012_s22 = sld [smem:[#allocation7 + $0x5]]  ;;  %p504_p5 = scmp.gt.s32.totalorder %s1604_s28, 0 }
  0xb0   : > { %p1605_p0 = scmp.lt.s32.totalorder %s1604_s28, 511  ;;  %s2712_s3 = smov [#allocation2 + $0x5]  }
  0xb1   : > { %s3014_s15 = sshll.u32 %s2712_s3, 4  ;;  %s1616_s13 = sld [smem:[#allocation7 + $0x6]]  ;;  %s542_s15 = int_to_ptr.vmem [resolvable:$true] %s3014_s15 }
  0xb2   : > { %s3252_s28 = smov (!%p504_p5, %s1604_s28), 0  ;;  %s2713_s2 = smov [#allocation2 + $0x6]  }
  0xb3   : > { %s3254_s28 = smov (!%p1605_p0, %s3252_s28), 511  ;;  %s3022_s7 = sshll.u32 %s2713_s2, 4  ;;  %s563_s7 = int_to_ptr.vmem [resolvable:$true] %s3022_s7 }
  0xb4   : > { %s508_s29 = scalar_lea.hbm %s3166_s1, %s3254_s28 }
  0xb5   : > { %p525_p3 = scmp.gt.s32.totalorder %s3012_s22, 0  ;;  %p1611_p10 = scmp.lt.s32.totalorder %s3012_s22, 511 }
  0xb6   : > { %s518_s26 = sshll.u32 %s508_s29, 4  ;;  %s519_s26 = int_to_ptr.hbm [resolvable:$true] %s518_s26 }
  0xb7   : > { %p546_p8 = scmp.gt.s32.totalorder %s1616_s13, 0  ;;  %p1617_p4 = scmp.lt.s32.totalorder %s1616_s13, 511 }
  0xb8   : > { %s2449_s30 = sshra.s32 %s519_s26, 4  ;;  %s2450_s30 = int_to_ptr.hbm [resolvable:$true] %s2449_s30 }
  0xb9   : > { %s2451_s12 = scalar_lea.hbm %s2450_s30, 1  ;;  %p2454_p13 = scmp.lt.s32.totalorder %s2450_s30, %s3166_s1 }
  0xba   : > { %p2452_p7 = scmp.ne.s32.totalorder %s2450_s30, %s2451_s12  ;;  %p2455_p6 = scmp.lt.s32.totalorder %s2966_s4, %s2451_s12 }
  0xbc   : > { %p2456_p9 = por %p2455_p6, %p2454_p13 }
  0xbe   : > { %p2457_p1 = pnand %p2456_p9, %p2452_p7 }
  0xc0   : > { %2460 = shalt.err (!%p2457_p1)  }
  0xc1   : > { %523 = dma.hbm_to_vmem [thread:$0]  %s519_s26, 16, %s521_s27, [#allocation5 + $0x4] }
  0xc2   : > { %s526_s28 = scalar_select %p525_p3, %s3012_s22, 0 }
  0xc3   : > { %s547_s8 = scalar_select %p546_p8, %s1616_s13, 0 }
  0xc4   : > { %s3256_s28 = smov (!%p1611_p10, %s526_s28), 511 }
  0xc5   : > { %s3258_s8 = smov (!%p1617_p4, %s547_s8), 511  ;;  %s529_s25 = scalar_lea.hbm %s3166_s1, %s3256_s28 }
  0xc6   : > { %s539_s11 = sshll.u32 %s529_s25, 4  ;;  %s550_s30 = scalar_lea.hbm %s3166_s1, %s3258_s8  ;;  %s540_s11 = int_to_ptr.hbm [resolvable:$true] %s539_s11 }
  0xc7   : > { %s560_s27 = sshll.u32 %s550_s30, 4  ;;  %s2473_s26 = sshra.s32 %s540_s11, 4  ;;  %s2474_s26 = int_to_ptr.hbm [resolvable:$true] %s2473_s26  ;;  %s561_s27 = int_to_ptr.hbm [resolvable:$true] %s560_s27 }
  0xc8   : > { %s2475_s12 = scalar_lea.hbm %s2474_s26, 1  ;;  %p2478_p5 = scmp.lt.s32.totalorder %s2474_s26, %s3166_s1 }
  0xc9   : > { %p2476_p2 = scmp.ne.s32.totalorder %s2474_s26, %s2475_s12  ;;  %p2479_p0 = scmp.lt.s32.totalorder %s2966_s4, %s2475_s12 }
  0xcb   : > { %p2480_p3 = por %p2479_p0, %p2478_p5 }
  0xcd   : > { %p2481_p10 = pnand %p2480_p3, %p2476_p2 }
  0xcf   : > { %2484 = shalt.err (!%p2481_p10)  }
  0xd0   : > { %544 = dma.hbm_to_vmem [thread:$0]  %s540_s11, 16, %s542_s15, [#allocation5 + $0x5] }
  0xd1   : > { %s1622_s13 = sld [smem:[#allocation7 + $0x7]]  ;;  %s2497_s6 = sshra.s32 %s561_s27, 4  ;;  %s2498_s6 = int_to_ptr.hbm [resolvable:$true] %s2497_s6 }
  0xd2   : > { %s2499_s28 = scalar_lea.hbm %s2498_s6, 1  ;;  %p2502_p4 = scmp.lt.s32.totalorder %s2498_s6, %s3166_s1 }
  0xd3   : > { %p2500_p8 = scmp.ne.s32.totalorder %s2498_s6, %s2499_s28  ;;  %p2503_p7 = scmp.lt.s32.totalorder %s2966_s4, %s2499_s28 }
  0xd5   : > { %p2504_p13 = por %p2503_p7, %p2502_p4 }
  0xd7   : > { %p2505_p6 = pnand %p2504_p13, %p2500_p8 }
  0xd9   : > { %2508 = shalt.err (!%p2505_p6)  }
  0xda   : > { %565 = dma.hbm_to_vmem [thread:$0]  %s561_s27, 16, %s563_s7, [#allocation5 + $0x6] }
  0xdb   : > { %p567_p9 = scmp.gt.s32.totalorder %s1622_s13, 0  ;;  %p1623_p1 = scmp.lt.s32.totalorder %s1622_s13, 511 }
  0xdc   : > { %s2714_s15 = smov [#allocation2 + $0x7]  }
  0xdd   : > { %s3260_s13 = smov (!%p567_p9, %s1622_s13), 0  ;;  %s583_s3 = sshll.u32 %s2714_s15, 4  ;;  %s584_s3 = int_to_ptr.vmem [resolvable:$true] %s583_s3 }
  0xde   : > { %s3262_s13 = smov (!%p1623_p1, %s3260_s13), 511 }
  0xdf   : > { %s571_s29 = scalar_lea.hbm %s3166_s1, %s3262_s13 }
  0xe0   : > { %s581_s2 = sshll.u32 %s571_s29, 4  ;;  %s582_s2 = int_to_ptr.hbm [resolvable:$true] %s581_s2 }
  0xe1   : > { %s2521_s30 = sshra.s32 %s582_s2, 4  ;;  %s2522_s30 = int_to_ptr.hbm [resolvable:$true] %s2521_s30 }
  0xe2   : > { %s2523_s26 = scalar_lea.hbm %s2522_s30, 1  ;;  %p2526_p5 = scmp.lt.s32.totalorder %s2522_s30, %s3166_s1 }
  0xe3   : > { %p2524_p2 = scmp.ne.s32.totalorder %s2522_s30, %s2523_s26  ;;  %p2527_p0 = scmp.lt.s32.totalorder %s2966_s4, %s2523_s26 }
  0xe5   : > { %p2528_p3 = por %p2527_p0, %p2526_p5 }
  0xe7   : > { %p2529_p10 = pnand %p2528_p3, %p2524_p2 }
  0xe9   : > { %2532 = shalt.err (!%p2529_p10)  }
  0xea   : > { %586 = dma.hbm_to_vmem [thread:$0]  %s582_s2, 16, %s584_s3, [#allocation5 + $0x7] }
  0xeb   : > { %2659 = dma.done.wait [#allocation5], 16 }
  0xec   : > { %2660 = vsyncadd [#allocation5], 4294967280 }
  0xed   : > { %2661 = dma.done.wait [#allocation5 + $0x1], 16 }
  0xee   : > { %2662 = vsyncadd [#allocation5 + $0x1], 4294967280 }
  0xef   : > { %2663 = dma.done.wait [#allocation5 + $0x2], 16 }
  0xf0   : > { %2664 = vsyncadd [#allocation5 + $0x2], 4294967280 }
  0xf1   : > { %2665 = dma.done.wait [#allocation5 + $0x3], 16 }
  0xf2   : > { %2666 = vsyncadd [#allocation5 + $0x3], 4294967280 }
  0xf3   : > { %2667 = dma.done.wait [#allocation5 + $0x4], 16 }
  0xf4   : > { %2668 = vsyncadd [#allocation5 + $0x4], 4294967280 }
  0xf5   : > { %2669 = dma.done.wait [#allocation5 + $0x5], 16 }
  0xf6   : > { %2670 = vsyncadd [#allocation5 + $0x5], 4294967280 }
  0xf7   : > { %2671 = dma.done.wait [#allocation5 + $0x6], 16 }
  0xf8   : > { %2672 = vsyncadd [#allocation5 + $0x6], 4294967280 }
  0xf9   : > { %2673 = dma.done.wait [#allocation5 + $0x7], 16 }
  0xfa   : > { %2674 = vsyncadd [#allocation5 + $0x7], 4294967280  ;;  %v1742_v0 = vld [vmem:[#allocation13 + $0xe0] sm:$0xf]  ;;  %v2015_v1 = vld [vmem:[#allocation13 + $0xec] sm:$0xf0] }
  0xfb   : > { %v2013_v2 = vld [vmem:[#allocation13 + $0xe4] sm:$0xf]  ;;  %v1743_v3 = vor.u32 %v2015_v1, %v1742_v0  ;;  %v1744_v4 = vld [vmem:[#allocation13 + $0xf0] sm:$0xf0]  ;;  %v1870_v9 = vld [vmem:[#allocation13 + $0x1e0] sm:$0xf] }
  0xfc   : > { %v2045_v5 = vld [vmem:[#allocation13 + $0x1e4] sm:$0xf]  ;;  %v1872_v6 = vld [vmem:[#allocation13 + $0x1f0] sm:$0xf0]  ;;  %v1747_v7 = vor.u32 %v2013_v2, %v1744_v4  ;;  %v2047_v10 = vld [vmem:[#allocation13 + $0x1ec] sm:$0xf0] }
  0xfd   : > { %v1875_v8 = vor.u32 %v2045_v5, %v1872_v6  ;;  %v1726_v11 = vld [vmem:[#allocation13 + $0xc0] sm:$0xf]  ;;  %1010 = vmatpush.bf16.msra.mxu0 %v1743_v3  ;;  %v1871_v12 = vor.u32 %v2047_v10, %v1870_v9  ;;  %v2011_v13 = vld [vmem:[#allocation13 + $0xcc] sm:$0xf0]  ;;  %v2009_v14 = vld [vmem:[#allocation13 + $0xc4] sm:$0xf] }
  0xfe   : > { %v1728_v15 = vld [vmem:[#allocation13 + $0xd0] sm:$0xf0]  ;;  %1036 = vmatpush.bf16.msra.mxu2 %v1747_v7  ;;  %v1727_v16 = vor.u32 %v2011_v13, %v1726_v11  ;;  %v2041_v18 = vld [vmem:[#allocation13 + $0x1c4] sm:$0xf]  ;;  %v1854_v20 = vld [vmem:[#allocation13 + $0x1c0] sm:$0xf] }
  0xff   : > { %1049 = vmatpush.bf16.msra.mxu3 %v1875_v8  ;;  %v1731_v17 = vor.u32 %v2009_v14, %v1728_v15  ;;  %v1856_v19 = vld [vmem:[#allocation13 + $0x1d0] sm:$0xf0]  ;;  %1023 = vmatpush.bf16.msra.mxu1 %v1871_v12  ;;  %v2043_v22 = vld [vmem:[#allocation13 + $0x1cc] sm:$0xf0]  ;;  %v1710_v23 = vld [vmem:[#allocation13 + $0xa0] sm:$0xf] }
 0x100   : > { %v1859_v21 = vor.u32 %v2041_v18, %v1856_v19  ;;  %v2007_v24 = vld [vmem:[#allocation13 + $0xac] sm:$0xf0]  ;;  %v1855_v25 = vor.u32 %v2043_v22, %v1854_v20  ;;  %v2005_v26 = vld [vmem:[#allocation13 + $0xa4] sm:$0xf]  ;;  %v1712_v27 = vld [vmem:[#allocation13 + $0xb0] sm:$0xf0] }
 0x101   : > { %v2037_v28 = vld [vmem:[#allocation13 + $0x1a4] sm:$0xf]  ;;  %1011 = vmatpush.bf16.msra.mxu0 %v1727_v16  ;;  %v1711_v29 = vor.u32 %v2007_v24, %v1710_v23  ;;  %v1840_v30 = vld [vmem:[#allocation13 + $0x1b0] sm:$0xf0]  ;;  %v1838_v31 = vld [vmem:[#allocation13 + $0x1a0] sm:$0xf]  ;;  %v1715_v33 = vor.u32 %v2005_v26, %v1712_v27 }
 0x102   : > { %v2039_v32 = vld [vmem:[#allocation13 + $0x1ac] sm:$0xf0]  ;;  %1037 = vmatpush.bf16.msra.mxu2 %v1731_v17  ;;  %v1843_v34 = vor.u32 %v2037_v28, %v1840_v30  ;;  %v1694_v35 = vld [vmem:[#allocation13 + $0x80] sm:$0xf]  ;;  %v2001_v37 = vld [vmem:[#allocation13 + $0x84] sm:$0xf] }
 0x103   : > { %1050 = vmatpush.bf16.msra.mxu3 %v1859_v21  ;;  %v2003_v36 = vld [vmem:[#allocation13 + $0x8c] sm:$0xf0]  ;;  %1024 = vmatpush.bf16.msra.mxu1 %v1855_v25  ;;  %v1839_v38 = vor.u32 %v2039_v32, %v1838_v31  ;;  %v1696_v39 = vld [vmem:[#allocation13 + $0x90] sm:$0xf0]  ;;  %v2033_v40 = vld [vmem:[#allocation13 + $0x184] sm:$0xf] }
 0x104   : > { %v1824_v41 = vld [vmem:[#allocation13 + $0x190] sm:$0xf0]  ;;  %v1822_v42 = vld [vmem:[#allocation13 + $0x180] sm:$0xf]  ;;  %v2035_v43 = vld [vmem:[#allocation13 + $0x18c] sm:$0xf0]  ;;  %v1695_v44 = vor.u32 %v2003_v36, %v1694_v35  ;;  %v1699_v45 = vor.u32 %v2001_v37, %v1696_v39 }
 0x105   : > { %1012 = vmatpush.bf16.msra.mxu0 %v1711_v29  ;;  %v1827_v46 = vor.u32 %v2033_v40, %v1824_v41  ;;  %v1678_v47 = vld [vmem:[#allocation13 + $0x60] sm:$0xf]  ;;  %v1999_v48 = vld [vmem:[#allocation13 + $0x6c] sm:$0xf0]  ;;  %v1997_v49 = vld [vmem:[#allocation13 + $0x64] sm:$0xf]  ;;  %v1823_v50 = vor.u32 %v2035_v43, %v1822_v42 }
 0x106   : > { %1038 = vmatpush.bf16.msra.mxu2 %v1715_v33  ;;  %v1680_v51 = vld [vmem:[#allocation13 + $0x70] sm:$0xf0]  ;;  %v2029_v52 = vld [vmem:[#allocation13 + $0x164] sm:$0xf]  ;;  %v1806_v54 = vld [vmem:[#allocation13 + $0x160] sm:$0xf]  ;;  %v1679_v56 = vor.u32 %v1999_v48, %v1678_v47 }
 0x107   : > { %1051 = vmatpush.bf16.msra.mxu3 %v1843_v34  ;;  %1025 = vmatpush.bf16.msra.mxu1 %v1839_v38  ;;  %v1808_v53 = vld [vmem:[#allocation13 + $0x170] sm:$0xf0]  ;;  %v2031_v55 = vld [vmem:[#allocation13 + $0x16c] sm:$0xf0]  ;;  %v1683_v57 = vor.u32 %v1997_v49, %v1680_v51  ;;  %v1662_v59 = vld [vmem:[#allocation13 + $0x40] sm:$0xf] }
 0x108   : > { %v1811_v58 = vor.u32 %v2029_v52, %v1808_v53  ;;  %v1995_v60 = vld [vmem:[#allocation13 + $0x4c] sm:$0xf0]  ;;  %v1993_v61 = vld [vmem:[#allocation13 + $0x44] sm:$0xf]  ;;  %v1807_v62 = vor.u32 %v2031_v55, %v1806_v54  ;;  %v1664_v63 = vld [vmem:[#allocation13 + $0x50] sm:$0xf0] }
 0x109   : > { %1013 = vmatpush.bf16.msra.mxu0 %v1695_v44  ;;  %v2025_v0 = vld [vmem:[#allocation13 + $0x144] sm:$0xf]  ;;  %v1792_v1 = vld [vmem:[#allocation13 + $0x150] sm:$0xf0]  ;;  %v1790_v2 = vld [vmem:[#allocation13 + $0x140] sm:$0xf]  ;;  %v1663_v4 = vor.u32 %v1995_v60, %v1662_v59  ;;  %v1667_v5 = vor.u32 %v1993_v61, %v1664_v63 }
 0x10a   : > { %1039 = vmatpush.bf16.msra.mxu2 %v1699_v45  ;;  %v2027_v3 = vld [vmem:[#allocation13 + $0x14c] sm:$0xf0]  ;;  %v1795_v6 = vor.u32 %v2025_v0, %v1792_v1  ;;  %v1646_v7 = vld [vmem:[#allocation13 + $0x20] sm:$0xf]  ;;  %v1989_v9 = vld [vmem:[#allocation13 + $0x24] sm:$0xf] }
 0x10b   : > { %1052 = vmatpush.bf16.msra.mxu3 %v1827_v46  ;;  %1026 = vmatpush.bf16.msra.mxu1 %v1823_v50  ;;  %v1991_v8 = vld [vmem:[#allocation13 + $0x2c] sm:$0xf0]  ;;  %v1791_v10 = vor.u32 %v2027_v3, %v1790_v2  ;;  %v1648_v11 = vld [vmem:[#allocation13 + $0x30] sm:$0xf0]  ;;  %v2021_v12 = vld [vmem:[#allocation13 + $0x124] sm:$0xf] }
 0x10c   : > { %v1776_v13 = vld [vmem:[#allocation13 + $0x130] sm:$0xf0]  ;;  %v1774_v14 = vld [vmem:[#allocation13 + $0x120] sm:$0xf]  ;;  %v2023_v15 = vld [vmem:[#allocation13 + $0x12c] sm:$0xf0]  ;;  %v1647_v16 = vor.u32 %v1991_v8, %v1646_v7  ;;  %v1651_v19 = vor.u32 %v1989_v9, %v1648_v11 }
 0x10d   : > { %1014 = vmatpush.bf16.msra.mxu0 %v1679_v56  ;;  %v1630_v17 = vld [vmem:[#allocation13] sm:$0xf]  ;;  %v1987_v18 = vld [vmem:[#allocation13 + $0xc] sm:$0xf0]  ;;  %v1779_v20 = vor.u32 %v2021_v12, %v1776_v13  ;;  %v1985_v21 = vld [vmem:[#allocation13 + $0x4] sm:$0xf]  ;;  %v1775_v24 = vor.u32 %v2023_v15, %v1774_v14 }
 0x10e   : > { %1040 = vmatpush.bf16.msra.mxu2 %v1683_v57  ;;  %v1632_v22 = vld [vmem:[#allocation13 + $0x10] sm:$0xf0]  ;;  %v2017_v23 = vld [vmem:[#allocation13 + $0x104] sm:$0xf]  ;;  %v1750_v26 = vld [vmem:[#allocation13 + $0xe8] sm:$0xf]  ;;  %v1631_v31 = vor.u32 %v1987_v18, %v1630_v17 }
 0x10f   : > { %1053 = vmatpush.bf16.msra.mxu3 %v1811_v58  ;;  %1027 = vmatpush.bf16.msra.mxu1 %v1807_v62  ;;  %v1760_v25 = vld [vmem:[#allocation13 + $0x110] sm:$0xf0]  ;;  %v2016_v27 = vld [vmem:[#allocation13 + $0xf4] sm:$0xf0]  ;;  %v2014_v28 = vld [vmem:[#allocation13 + $0xec] sm:$0xf]  ;;  %v1635_v35 = vor.u32 %v1985_v21, %v1632_v22 }
 0x110   : > { %v1752_v29 = vld [vmem:[#allocation13 + $0xf8] sm:$0xf0]  ;;  %v2046_v30 = vld [vmem:[#allocation13 + $0x1ec] sm:$0xf]  ;;  %v1758_v33 = vld [vmem:[#allocation13 + $0x100] sm:$0xf]  ;;  %v1763_v36 = vor.u32 %v2017_v23, %v1760_v25  ;;  %v1751_v40 = vor.u32 %v2016_v27, %v1750_v26 }
 0x111   : > { %1015 = vmatpush.bf16.msra.mxu0 %v1663_v4  ;;  %v1880_v32 = vld [vmem:[#allocation13 + $0x1f8] sm:$0xf0]  ;;  %v2019_v34 = vld [vmem:[#allocation13 + $0x10c] sm:$0xf0]  ;;  %v612_v37 = vld [vmem:[#allocation2] sm:$0xff]  ;;  %v1755_v41 = vor.u32 %v2014_v28, %v1752_v29 }
 0x112   : > { %1041 = vmatpush.bf16.msra.mxu2 %v1667_v5  ;;  %v1878_v38 = vld [vmem:[#allocation13 + $0x1e8] sm:$0xf]  ;;  %v2048_v39 = vld [vmem:[#allocation13 + $0x1f4] sm:$0xf0]  ;;  %v614_v42 = vld [vmem:[#allocation8] sm:$0xff]  ;;  %v1883_v44 = vor.u32 %v2046_v30, %v1880_v32  ;;  %v1759_v45 = vor.u32 %v2019_v34, %v1758_v33  ;;  %v3061_v49 = vpack.c.bf16 %v612_v37, %v612_v37 }
 0x113   : > { %1054 = vmatpush.bf16.msra.mxu3 %v1795_v6  ;;  %1028 = vmatpush.bf16.msra.mxu1 %v1791_v10  ;;  %v1734_v43 = vld [vmem:[#allocation13 + $0xc8] sm:$0xf]  ;;  %v2012_v46 = vld [vmem:[#allocation13 + $0xd4] sm:$0xf0]  ;;  %v2010_v47 = vld [vmem:[#allocation13 + $0xcc] sm:$0xf]  ;;  %v1879_v50 = vor.u32 %v2048_v39, %v1878_v38  ;;  %v3063_v53 = vpack.c.bf16 %v614_v42, %v614_v42 }
 0x114   : > { %v1736_v48 = vld [vmem:[#allocation13 + $0xd8] sm:$0xf0]  ;;  %v2042_v51 = vld [vmem:[#allocation13 + $0x1cc] sm:$0xf]  ;;  %v1862_v54 = vld [vmem:[#allocation13 + $0x1c8] sm:$0xf]  ;;  %v1735_v56 = vor.u32 %v2012_v46, %v1734_v43 }
 0x115   : > { %1016 = vmatpush.bf16.msra.mxu0 %v1647_v16  ;;  %v1864_v52 = vld [vmem:[#allocation13 + $0x1d8] sm:$0xf0]  ;;  %v2044_v55 = vld [vmem:[#allocation13 + $0x1d4] sm:$0xf0]  ;;  %v1739_v57 = vor.u32 %v2010_v47, %v1736_v48  ;;  %v1718_v58 = vld [vmem:[#allocation13 + $0xa8] sm:$0xf] }
 0x116   : > { %1042 = vmatpush.bf16.msra.mxu2 %v1651_v19  ;;  %v1867_v59 = vor.u32 %v2042_v51, %v1864_v52  ;;  %v2008_v60 = vld [vmem:[#allocation13 + $0xb4] sm:$0xf0]  ;;  %v2006_v61 = vld [vmem:[#allocation13 + $0xac] sm:$0xf]  ;;  %v1720_v62 = vld [vmem:[#allocation13 + $0xb8] sm:$0xf0]  ;;  %v1863_v63 = vor.u32 %v2044_v55, %v1862_v54 }
 0x117   : > { %1055 = vmatpush.bf16.msra.mxu3 %v1779_v20  ;;  %1029 = vmatpush.bf16.msra.mxu1 %v1775_v24  ;;  %v2038_v0 = vld [vmem:[#allocation13 + $0x1ac] sm:$0xf]  ;;  %v1848_v1 = vld [vmem:[#allocation13 + $0x1b8] sm:$0xf0]  ;;  %v1846_v2 = vld [vmem:[#allocation13 + $0x1a8] sm:$0xf]  ;;  %v1719_v4 = vor.u32 %v2008_v60, %v1718_v58  ;;  %v1723_v5 = vor.u32 %v2006_v61, %v1720_v62 }
 0x118   : > { %v2040_v3 = vld [vmem:[#allocation13 + $0x1b4] sm:$0xf0]  ;;  %v1702_v6 = vld [vmem:[#allocation13 + $0x88] sm:$0xf]  ;;  %v1851_v7 = vor.u32 %v2038_v0, %v1848_v1  ;;  %v2002_v9 = vld [vmem:[#allocation13 + $0x8c] sm:$0xf] }
 0x119   : > { %1017 = vmatpush.bf16.msra.mxu0 %v1631_v31  ;;  %v2004_v8 = vld [vmem:[#allocation13 + $0x94] sm:$0xf0]  ;;  %v1704_v10 = vld [vmem:[#allocation13 + $0x98] sm:$0xf0]  ;;  %v1847_v11 = vor.u32 %v2040_v3, %v1846_v2  ;;  %v2034_v12 = vld [vmem:[#allocation13 + $0x18c] sm:$0xf] }
 0x11a   : > { %1043 = vmatpush.bf16.msra.mxu2 %v1635_v35  ;;  %v1832_v13 = vld [vmem:[#allocation13 + $0x198] sm:$0xf0]  ;;  %v1830_v14 = vld [vmem:[#allocation13 + $0x188] sm:$0xf]  ;;  %v2036_v15 = vld [vmem:[#allocation13 + $0x194] sm:$0xf0]  ;;  %v1703_v16 = vor.u32 %v2004_v8, %v1702_v6  ;;  %v1707_v17 = vor.u32 %v2002_v9, %v1704_v10 }
 0x11b   : > { %1056 = vmatpush.bf16.msra.mxu3 %v1763_v36  ;;  %1030 = vmatpush.bf16.msra.mxu1 %v1759_v45  ;;  %v1686_v18 = vld [vmem:[#allocation13 + $0x68] sm:$0xf]  ;;  %v1835_v19 = vor.u32 %v2034_v12, %v1832_v13  ;;  %v2000_v20 = vld [vmem:[#allocation13 + $0x74] sm:$0xf0]  ;;  %v1998_v21 = vld [vmem:[#allocation13 + $0x6c] sm:$0xf]  ;;  %v1831_v23 = vor.u32 %v2036_v15, %v1830_v14 }
 0x11c   : > { %1018 = vmatmul.bf16.vlgmr.msra.gmra.mxu0 %v3061_v49  ;;  %v1688_v22 = vld [vmem:[#allocation13 + $0x78] sm:$0xf0]  ;;  %v2030_v24 = vld [vmem:[#allocation13 + $0x16c] sm:$0xf]  ;;  %v1814_v26 = vld [vmem:[#allocation13 + $0x168] sm:$0xf]  ;;  %v1687_v28 = vor.u32 %v2000_v20, %v1686_v18 }
 0x11d   : > { %1062 = vmatpush.bf16.msrb.mxu0 %v1751_v40  ;;  %1044 = vmatmul.bf16.vlgmr.msra.gmra.mxu2 %v3061_v49  ;;  %v1816_v25 = vld [vmem:[#allocation13 + $0x178] sm:$0xf0]  ;;  %v2032_v27 = vld [vmem:[#allocation13 + $0x174] sm:$0xf0]  ;;  %v1691_v29 = vor.u32 %v1998_v21, %v1688_v22  ;;  %v1670_v30 = vld [vmem:[#allocation13 + $0x48] sm:$0xf] }
 0x11e   : > { %1088 = vmatpush.bf16.msrb.mxu2 %v1755_v41  ;;  %1057 = vmatmul.bf16.vlgmr.msra.gmra.mxu3 %v3063_v53  ;;  %v1819_v31 = vor.u32 %v2030_v24, %v1816_v25  ;;  %v1996_v32 = vld [vmem:[#allocation13 + $0x54] sm:$0xf0]  ;;  %v1994_v33 = vld [vmem:[#allocation13 + $0x4c] sm:$0xf]  ;;  %v1672_v34 = vld [vmem:[#allocation13 + $0x58] sm:$0xf0]  ;;  %v1815_v35 = vor.u32 %v2032_v27, %v1814_v26 }
 0x11f   : > { %1101 = vmatpush.bf16.msrb.mxu3 %v1883_v44  ;;  %1075 = vmatpush.bf16.msrb.mxu1 %v1879_v50  ;;  %v2026_v36 = vld [vmem:[#allocation13 + $0x14c] sm:$0xf]  ;;  %v1800_v37 = vld [vmem:[#allocation13 + $0x158] sm:$0xf0]  ;;  %v1798_v38 = vld [vmem:[#allocation13 + $0x148] sm:$0xf]  ;;  %v1671_v40 = vor.u32 %v1996_v32, %v1670_v30  ;;  %v1675_v41 = vor.u32 %v1994_v33, %v1672_v34 }
 0x120   : > { %1031 = vmatmul.bf16.vlgmr.msra.gmra.mxu1 %v3063_v53  ;;  %v2028_v39 = vld [vmem:[#allocation13 + $0x154] sm:$0xf0]  ;;  %v1654_v42 = vld [vmem:[#allocation13 + $0x28] sm:$0xf]  ;;  %v1803_v43 = vor.u32 %v2026_v36, %v1800_v37  ;;  %v1990_v45 = vld [vmem:[#allocation13 + $0x2c] sm:$0xf] }
 0x121   : > { %1063 = vmatpush.bf16.msrb.mxu0 %v1735_v56  ;;  %v1992_v44 = vld [vmem:[#allocation13 + $0x34] sm:$0xf0]  ;;  %v1656_v46 = vld [vmem:[#allocation13 + $0x38] sm:$0xf0]  ;;  %v1799_v47 = vor.u32 %v2028_v39, %v1798_v38  ;;  %v2022_v48 = vld [vmem:[#allocation13 + $0x12c] sm:$0xf] }
 0x122   : > { %1089 = vmatpush.bf16.msrb.mxu2 %v1739_v57  ;;  %v1784_v50 = vld [vmem:[#allocation13 + $0x138] sm:$0xf0]  ;;  %v1782_v51 = vld [vmem:[#allocation13 + $0x128] sm:$0xf]  ;;  %v2024_v52 = vld [vmem:[#allocation13 + $0x134] sm:$0xf0]  ;;  %v1655_v54 = vor.u32 %v1992_v44, %v1654_v42  ;;  %v1659_v55 = vor.u32 %v1990_v45, %v1656_v46 }
 0x123   : > { %1102 = vmatpush.bf16.msrb.mxu3 %v1867_v59  ;;  %1076 = vmatpush.bf16.msrb.mxu1 %v1863_v63  ;;  %v1638_v56 = vld [vmem:[#allocation13 + $0x8] sm:$0xf]  ;;  %v1787_v57 = vor.u32 %v2022_v48, %v1784_v50  ;;  %v1988_v58 = vld [vmem:[#allocation13 + $0x14] sm:$0xf0]  ;;  %v1986_v59 = vld [vmem:[#allocation13 + $0xc] sm:$0xf]  ;;  %v1783_v61 = vor.u32 %v2024_v52, %v1782_v51 }
 0x124   : > { %v1640_v60 = vld [vmem:[#allocation13 + $0x18] sm:$0xf0]  ;;  %v2018_v62 = vld [vmem:[#allocation13 + $0x10c] sm:$0xf]  ;;  %v1766_v0 = vld [vmem:[#allocation13 + $0x108] sm:$0xf]  ;;  %v1639_v2 = vor.u32 %v1988_v58, %v1638_v56 }
 0x125   : > { %1064 = vmatpush.bf16.msrb.mxu0 %v1719_v4  ;;  %v1768_v63 = vld [vmem:[#allocation13 + $0x118] sm:$0xf0]  ;;  %v2020_v1 = vld [vmem:[#allocation13 + $0x114] sm:$0xf0]  ;;  %v1643_v3 = vor.u32 %v1986_v59, %v1640_v60 }
 0x126   : > { %1090 = vmatpush.bf16.msrb.mxu2 %v1723_v5  ;;  %v1771_v4 = vor.u32 %v2018_v62, %v1768_v63  ;;  %v1767_v5 = vor.u32 %v2020_v1, %v1766_v0  ;;  %v680_v6 = vld [vmem:[%s3170_s5] sm:$0xf] }
 0x127   : > { %1103 = vmatpush.bf16.msrb.mxu3 %v1851_v7  ;;  %1077 = vmatpush.bf16.msrb.mxu1 %v1847_v11  ;;  %v682_v7 = vperm.slane %v680_v6, 0  ;;  %v683_v10 = vperm.slane %v680_v6, 1  ;;  %v1172_v58 = vld [vmem:[#allocation11] sm:$0xff] }
 0x129   : > { %1065 = vmatpush.bf16.msrb.mxu0 %v1703_v16 }
 0x12a   : > { %1091 = vmatpush.bf16.msrb.mxu2 %v1707_v17 }
 0x12b   : > { %1104 = vmatpush.bf16.msrb.mxu3 %v1835_v19  ;;  %1078 = vmatpush.bf16.msrb.mxu1 %v1831_v23 }
 0x12d   : > { %1066 = vmatpush.bf16.msrb.mxu0 %v1687_v28  ;;  %v684_v28 = vperm.slane %v680_v6, 2 }
 0x12e   : > { %1092 = vmatpush.bf16.msrb.mxu2 %v1691_v29 }
 0x12f   : > { %1105 = vmatpush.bf16.msrb.mxu3 %v1819_v31  ;;  %1079 = vmatpush.bf16.msrb.mxu1 %v1815_v35 }
 0x131   : > { %1067 = vmatpush.bf16.msrb.mxu0 %v1671_v40 }
 0x132   : > { %1093 = vmatpush.bf16.msrb.mxu2 %v1675_v41 }
 0x133   : > { %1106 = vmatpush.bf16.msrb.mxu3 %v1803_v43  ;;  %1080 = vmatpush.bf16.msrb.mxu1 %v1799_v47  ;;  %v685_v43 = vperm.slane %v680_v6, 3 }
 0x135   : > { %1068 = vmatpush.bf16.msrb.mxu0 %v1655_v54 }
 0x136   : > { %1094 = vmatpush.bf16.msrb.mxu2 %v1659_v55 }
 0x137   : > { %1107 = vmatpush.bf16.msrb.mxu3 %v1787_v57  ;;  %1081 = vmatpush.bf16.msrb.mxu1 %v1783_v61 }
 0x139   : > { %1069 = vmatpush.bf16.msrb.mxu0 %v1639_v2 }
 0x13a   : > { %1095 = vmatpush.bf16.msrb.mxu2 %v1643_v3 }
 0x13b   : > { %1108 = vmatpush.bf16.msrb.mxu3 %v1771_v4  ;;  %1082 = vmatpush.bf16.msrb.mxu1 %v1767_v5 }
 0x13c   : > { %1070 = vmatmul.bf16.vlgmr.msrb.gmra.mxu0 %v3061_v49 }
 0x13d   : > { %1096 = vmatmul.bf16.vlgmr.msrb.gmra.mxu2 %v3061_v49 }
 0x13e   : > { %1109 = vmatmul.bf16.vlgmr.msrb.gmra.mxu3 %v3063_v53  ;;  %1083 = vmatmul.bf16.vlgmr.msrb.gmra.mxu1 %v3063_v53 }
 0x199   : > { %v1019_v8 = vpop.f32.mrf.mxu0 }
 0x19a   : > { %v1020_v9 = vadd.f32 %v1019_v8, %v682_v7 }
 0x19d   : > { %v1032_v11 = vpop.f32.mrf.mxu1 }
 0x19e   : > { %v1033_v12 = vadd.f32 %v1032_v11, %v1020_v9 }
 0x1a0   : > { %v1045_v13 = vpop.f32.mrf.mxu2  ;;  %v1884_v14 = vmul.f32 -1.442695, %v1033_v12 }
 0x1a1   : > { %v1046_v15 = vadd.f32 %v1045_v13, %v683_v10  ;;  %v1058_v16 = vpop.f32.mrf.mxu3  ;;  %v1021_v17 = vpop.f32.mrf.mxu0 }
 0x1a2   : > { %2175 = vpow2.f32 %v1884_v14 }
 0x1a3   : > { %v1059_v49 = vadd.f32 %v1058_v16, %v1046_v15 }
 0x1a5   : > { %v1885_v18 = vmul.f32 -1.442695, %v1059_v49  ;;  %v1034_v19 = vpop.f32.mrf.mxu1 }
 0x1a7   : > { %2177 = vpow2.f32 %v1885_v18 }
 0x1a8   : > { %v2176_v53 = vpop.eup %2175  ;;  %v1047_v20 = vpop.f32.mrf.mxu2 }
 0x1a9   : > { %v1117_v21 = vadd.f32 1.0, %v2176_v53  ;;  %v1060_v22 = vpop.f32.mrf.mxu3 }
 0x1ab   : > { %2179 = vrcp.f32 %v1117_v21  ;;  %vm1123_vm0 = vweird.f32 %v1117_v21  ;;  %v1127_v33 = vand.u32 2147483647, %v1117_v21  ;;  %v1129_v36 = vand.u32 2147483648, %v1117_v21 }
 0x1ad   : > { %v2178_v23 = vpop.eup %2177  ;;  %v1130_v46 = vor.u32 1.1754944e-38, %v1129_v36  ;;  %vm1128_vm6 = vcmp.eq.f32.partialorder %v1127_v33, 8.507059e+37 }
 0x1ae   : > { %v1136_v24 = vadd.f32 1.0, %v2178_v23 }
 0x1b0   : > { %2181 = vrcp.f32 %v1136_v24  ;;  %vm1142_vm2 = vweird.f32 %v1136_v24  ;;  %v1148_v34 = vand.u32 2147483648, %v1136_v24  ;;  %v1146_v40 = vand.u32 2147483647, %v1136_v24 }
 0x1b1   : > { %v2180_v25 = vpop.eup %2179 }
 0x1b2   : > { %v1119_v26 = vmul.f32 %v2180_v25, %v1117_v21  ;;  %vm1124_vm1 = vweird.f32 %v2180_v25  ;;  %v1149_v45 = vor.u32 1.1754944e-38, %v1148_v34  ;;  %vm1147_vm7 = vcmp.eq.f32.partialorder %v1146_v40, 8.507059e+37 }
 0x1b3   : > { %vm3076_vm4 = vmor %vm1123_vm0, %vm1124_vm1 }
 0x1b4   : > { %v1120_v27 = vsub.f32 1.0, %v1119_v26 }
 0x1b6   : > { %v2182_v29 = vpop.eup %2181  ;;  %v1121_v30 = vmul.f32 %v2180_v25, %v1120_v27 }
 0x1b7   : > { %v1138_v31 = vmul.f32 %v2182_v29, %v1136_v24  ;;  %vm1143_vm3 = vweird.f32 %v2182_v29 }
 0x1b8   : > { %v1122_v39 = vadd.f32 %v2180_v25, %v1121_v30  ;;  %vm1144_vm5 = vmor %vm1142_vm2, %vm1143_vm3 }
 0x1b9   : > { %v1071_v32 = vpop.f32.mrf.mxu0  ;;  %v1139_v37 = vsub.f32 1.0, %v1138_v31 }
 0x1ba   : > { %v1072_v35 = vadd.f32 %v1071_v32, %v684_v28  ;;  %v1126_v47 = vsel %vm3076_vm4, %v2180_v25, %v1122_v39 }
 0x1bb   : > { %v1084_v38 = vpop.f32.mrf.mxu1  ;;  %v1140_v44 = vmul.f32 %v2182_v29, %v1139_v37  ;;  %v1131_v56 = vsel %vm1128_vm6, %v1130_v46, %v1126_v47 }
 0x1bc   : > { %v1085_v41 = vadd.f32 %v1084_v38, %v1072_v35 }
 0x1bd   : > { %v1141_v48 = vadd.f32 %v2182_v29, %v1140_v44 }
 0x1be   : > { %2183 = vtanh.f32 %v1085_v41 }
 0x1bf   : > { %v1145_v54 = vsel %vm1144_vm5, %v2182_v29, %v1141_v48 }
 0x1c0   : > { %v1097_v50 = vpop.f32.mrf.mxu2  ;;  %v1150_v57 = vsel %vm1147_vm7, %v1149_v45, %v1145_v54 }
 0x1c1   : > { %v1098_v51 = vadd.f32 %v1097_v50, %v685_v43  ;;  %v1110_v52 = vpop.f32.mrf.mxu3  ;;  %v1073_v55 = vpop.f32.mrf.mxu0  ;;  %v1173_v63 = vmul.f32 %v1172_v58, %v1150_v57 }
 0x1c3   : > { %v1111_v59 = vadd.f32 %v1110_v52, %v1098_v51  ;;  %v1086_v60 = vpop.f32.mrf.mxu1 }
 0x1c4   : > { %v2184_v61 = vpop.eup %2183 }
 0x1c5   : > { %v1886_v62 = vmul.f32 -1.442695, %v1111_v59  ;;  %v1174_v0 = vmul.f32 %v2184_v61, %v1131_v56 }
 0x1c7   : > { %2185 = vpow2.f32 %v1886_v62  ;;  %v1175_v1 = vadd.f32 %v1174_v0, %v1173_v63 }
 0x1c8   : > { %v1099_v2 = vpop.f32.mrf.mxu2 }
 0x1c9   : > { %v1112_v3 = vpop.f32.mrf.mxu3  ;;  %1181 = vst [vmem:[#allocation20] sm:$0xff] %v1175_v1 }
 0x1cd   : > { %v2186_v4 = vpop.eup %2185 }
 0x1ce   : > { %v1156_v5 = vadd.f32 1.0, %v2186_v4 }
 0x1d0   : > { %2187 = vrcp.f32 %v1156_v5  ;;  %v1168_v9 = vand.u32 2147483648, %v1156_v5  ;;  %v1166_v11 = vand.u32 2147483647, %v1156_v5  ;;  %vm1162_vm9 = vweird.f32 %v1156_v5 }
 0x1d1   : > { %2189 = vtanh.f32 %v1175_v1 }
 0x1d2   : > { %v1169_v13 = vor.u32 1.1754944e-38, %v1168_v9  ;;  %vm1167_vm11 = vcmp.eq.f32.partialorder %v1166_v11, 8.507059e+37 }
 0x1d6   : > { %v2188_v6 = vpop.eup %2187 }
 0x1d7   : > { %v1158_v7 = vmul.f32 %v2188_v6, %v1156_v5  ;;  %vm1163_vm8 = vweird.f32 %v2188_v6  ;;  %v2190_v15 = vpop.eup %2189 }
 0x1d8   : > { %vm1164_vm10 = vmor %vm1162_vm9, %vm1163_vm8 }
 0x1d9   : > { %v1159_v8 = vsub.f32 1.0, %v1158_v7 }
 0x1db   : > { %v1160_v10 = vmul.f32 %v2188_v6, %v1159_v8 }
 0x1dd   : > { %v1161_v12 = vadd.f32 %v2188_v6, %v1160_v10 }
 0x1df   : > { %v1165_v14 = vsel %vm1164_vm10, %v2188_v6, %v1161_v12 }
 0x1e0   : > { %v1170_v16 = vsel %vm1167_vm11, %v1169_v13, %v1165_v14 }
 0x1e1   : > { %v1177_v49 = vmul.f32 %v2190_v15, %v1170_v16 }
 0x1e3   : > { %1178 = vst [vmem:[#allocation3] sm:$0xff] %v1177_v49 }
 0x1e4   : > { %1180 = vst [vmem:[#allocation18] sm:$0xff] %v1177_v49 }
 0x1e5 PF: > { %v1945_v17 = vld [vmem:[%s2930_s17 + $0x70] sm:$0xf]  ;;  %v2064_v18 = vld [vmem:[%s2930_s17 + $0x74] sm:$0xf0]  ;;  %v2063_v19 = vld [vmem:[%s2930_s17 + $0x74] sm:$0xf] }
 0x1e6   : > { %v1946_v53 = vor.u32 %v2064_v18, %v1945_v17  ;;  %v1947_v20 = vld [vmem:[%s2930_s17 + $0x78] sm:$0xf0]  ;;  %v1937_v21 = vld [vmem:[%s2930_s17 + $0x60] sm:$0xf]  ;;  %v2062_v22 = vld [vmem:[%s2930_s17 + $0x64] sm:$0xf0] }
 0x1e7   : > { %v1950_v23 = vor.u32 %v2063_v19, %v1947_v20  ;;  %v2061_v24 = vld [vmem:[%s2930_s17 + $0x64] sm:$0xf]  ;;  %v1939_v25 = vld [vmem:[%s2930_s17 + $0x68] sm:$0xf0]  ;;  %v1938_v26 = vor.u32 %v2062_v22, %v1937_v21  ;;  %v1929_v28 = vld [vmem:[%s2930_s17 + $0x50] sm:$0xf] }
 0x1e8   : > { %1286 = vmatpush.bf16.msra.mxu0 %v1946_v53  ;;  %v1942_v27 = vor.u32 %v2061_v24, %v1939_v25  ;;  %v2060_v29 = vld [vmem:[%s2930_s17 + $0x54] sm:$0xf0]  ;;  %v2059_v30 = vld [vmem:[%s2930_s17 + $0x54] sm:$0xf]  ;;  %v1931_v31 = vld [vmem:[%s2930_s17 + $0x58] sm:$0xf0] }
 0x1e9   : > { %1299 = vmatpush.bf16.msra.mxu1 %v1950_v23  ;;  %v1930_v32 = vor.u32 %v2060_v29, %v1929_v28  ;;  %v1934_v33 = vor.u32 %v2059_v30, %v1931_v31  ;;  %v1921_v34 = vld [vmem:[%s2930_s17 + $0x40] sm:$0xf]  ;;  %v2058_v35 = vld [vmem:[%s2930_s17 + $0x44] sm:$0xf0]  ;;  %v2057_v36 = vld [vmem:[%s2930_s17 + $0x44] sm:$0xf] }
 0x1ea   : > { %v1923_v37 = vld [vmem:[%s2930_s17 + $0x48] sm:$0xf0]  ;;  %v1922_v38 = vor.u32 %v2058_v35, %v1921_v34  ;;  %v1913_v40 = vld [vmem:[%s2930_s17 + $0x30] sm:$0xf]  ;;  %v2056_v41 = vld [vmem:[%s2930_s17 + $0x34] sm:$0xf0] }
 0x1eb   : > { %v1926_v39 = vor.u32 %v2057_v36, %v1923_v37  ;;  %v2055_v42 = vld [vmem:[%s2930_s17 + $0x34] sm:$0xf]  ;;  %v1915_v43 = vld [vmem:[%s2930_s17 + $0x38] sm:$0xf0]  ;;  %v1914_v44 = vor.u32 %v2056_v41, %v1913_v40  ;;  %v1905_v46 = vld [vmem:[%s2930_s17 + $0x20] sm:$0xf] }
 0x1ec   : > { %1287 = vmatpush.bf16.msra.mxu0 %v1938_v26  ;;  %v1918_v45 = vor.u32 %v2055_v42, %v1915_v43  ;;  %v2054_v47 = vld [vmem:[%s2930_s17 + $0x24] sm:$0xf0]  ;;  %v2053_v48 = vld [vmem:[%s2930_s17 + $0x24] sm:$0xf]  ;;  %v1907_v50 = vld [vmem:[%s2930_s17 + $0x28] sm:$0xf0] }
 0x1ed   : > { %1300 = vmatpush.bf16.msra.mxu1 %v1942_v27  ;;  %v1906_v51 = vor.u32 %v2054_v47, %v1905_v46  ;;  %v1910_v52 = vor.u32 %v2053_v48, %v1907_v50  ;;  %v1897_v54 = vld [vmem:[%s2930_s17 + $0x10] sm:$0xf]  ;;  %v2052_v55 = vld [vmem:[%s2930_s17 + $0x14] sm:$0xf0]  ;;  %v2051_v56 = vld [vmem:[%s2930_s17 + $0x14] sm:$0xf] }
 0x1ee   : > { %v1899_v57 = vld [vmem:[%s2930_s17 + $0x18] sm:$0xf0]  ;;  %v1898_v58 = vor.u32 %v2052_v55, %v1897_v54  ;;  %v1889_v60 = vld [vmem:[%s2930_s17] sm:$0xf]  ;;  %v2050_v61 = vld [vmem:[%s2930_s17 + $0x4] sm:$0xf0] }
 0x1ef   : > { %v1902_v59 = vor.u32 %v2051_v56, %v1899_v57  ;;  %v2049_v62 = vld [vmem:[%s2930_s17 + $0x4] sm:$0xf]  ;;  %v1891_v63 = vld [vmem:[%s2930_s17 + $0x8] sm:$0xf0]  ;;  %v1890_v0 = vor.u32 %v2050_v61, %v1889_v60  ;;  %s1342_s13 = sshll.u32 %s3174_s9, 4  ;;  %s2715_s6 = smov [#allocation18]   ;;  %s1343_s13 = int_to_ptr.hbm [resolvable:$true] %s1342_s13 }
 0x1f0   : > { %1288 = vmatpush.bf16.msra.mxu0 %v1930_v32  ;;  %v1182_v1 = vld [vmem:[#allocation3] sm:$0xff]  ;;  %v1894_v2 = vor.u32 %v2049_v62, %v1891_v63  ;;  %s1340_s17 = sshll.u32 %s2715_s6, 4  ;;  %p3225_p8 = scmp.eq.s32.totalorder %s2796_s20, 1  ;;  %v1200_v4 = vld [vmem:[%s2938_s14] sm:$0x3]  ;;  %s1341_s17 = int_to_ptr.vmem [resolvable:$true] %s1340_s17 }
 0x1f1   : > { %1301 = vmatpush.bf16.msra.mxu1 %v1934_v33  ;;  %v1183_v3 = vpack.c.bf16 %v1182_v1, %v1182_v1  ;;  %s1354_s21 = sshll.u32 %s3175_s10, 4  ;;  %s2716_s15 = smov [#allocation20]   ;;  %v1202_v5 = vperm.slane %v1200_v4, 0  ;;  %v1203_v6 = vperm.slane %v1200_v4, 1  ;;  %s1355_s21 = int_to_ptr.hbm [resolvable:$true] %s1354_s21 }
 0x1f2   : > { %2084 = dma.vmem_to_hbm [thread:$0]  (%p3225_p8), %s1341_s17, 128, %s1343_s13, [#allocation19]  }
 0x1f3   : > { %s1352_s3 = sshll.u32 %s2716_s15, 4  ;;  %p3226_p4 = pmov %p3225_p8  ;;  %s1353_s3 = int_to_ptr.vmem [resolvable:$true] %s1352_s3 }
 0x1f4   : > { %1289 = vmatpush.bf16.msra.mxu0 %v1922_v38  ;;  %s2065_s25 = sshll.u32 %s2796_s20, 4  ;;  %s3227_s2 = sld [smem:[#allocation65_spill]] }
 0x1f5   : > { %1302 = vmatpush.bf16.msra.mxu1 %v1926_v39  ;;  %2086 = dma.vmem_to_hbm [thread:$0]  (%p3226_p4), %s1353_s3, 128, %s1355_s21, [#allocation19]  }
 0x1f6   : > { %s1328_s12 = sshll.u32 %s2940_s24, 4  ;;  %s1315_s4 = scalar_lea.sflag [#allocation10], %s2927_s23  ;;  %s1329_s12 = int_to_ptr.vmem [resolvable:$true] %s1328_s12 }
 0x1f8   : > { %1290 = vmatpush.bf16.msra.mxu0 %v1914_v44 }
 0x1f9   : > { %1303 = vmatpush.bf16.msra.mxu1 %v1918_v45 }
 0x1fa   : > { %s1326_s30 = scalar_lea.hbm %s3227_s2, %s2065_s25  ;;  %s2621_s13 = scalar_lea.hbm %s3227_s2, 32 }
 0x1fb   : > { %s1330_s7 = sshll.u32 %s1326_s30, 4  ;;  %s1331_s7 = int_to_ptr.hbm [resolvable:$true] %s1330_s7 }
 0x1fc   : > { %1291 = vmatpush.bf16.msra.mxu0 %v1906_v51  ;;  %s2615_s27 = sshra.s32 %s1331_s7, 4  ;;  %s2616_s27 = int_to_ptr.hbm [resolvable:$true] %s2615_s27 }
 0x1fd   : > { %1304 = vmatpush.bf16.msra.mxu1 %v1910_v52  ;;  %s2617_s14 = scalar_lea.hbm %s2616_s27, 16  ;;  %p2622_p9 = scmp.lt.s32.totalorder %s2616_s27, %s3227_s2 }
 0x1fe   : > { %p2618_p7 = scmp.ne.s32.totalorder %s2616_s27, %s2617_s14  ;;  %p2623_p1 = scmp.lt.s32.totalorder %s2621_s13, %s2617_s14 }
 0x200   : > { %1292 = vmatpush.bf16.msra.mxu0 %v1898_v58  ;;  %p2619_p13 = pnand %p2618_p7, %p2829_p11  ;;  %p2624_p2 = por %p2623_p1, %p2622_p9 }
 0x201   : > { %1305 = vmatpush.bf16.msra.mxu1 %v1902_v59 }
 0x202   : > { %p2620_p6 = pneg %p2619_p13 }
 0x204   : > { %1293 = vmatpush.bf16.msra.mxu0 %v1890_v0  ;;  %p2625_p5 = pnand %p2624_p2, %p2620_p6 }
 0x205   : > { %1306 = vmatpush.bf16.msra.mxu1 %v1894_v2 }
 0x207   : > { %1294 = vmatmul.bf16.vlgmr.msra.gmra.mxu0 %v1183_v3 }
 0x208   : > { %1307 = vmatmul.bf16.vlgmr.msra.gmra.mxu1 %v1183_v3 }
 0x284   : > { %v1295_v7 = vpop.f32.mrf.mxu0 }
 0x285   : > { %v1296_v8 = vadd.f32 %v1295_v7, %v1202_v5  ;;  %v1308_v9 = vpop.f32.mrf.mxu1 }
 0x286   : > { %v1309_v10 = vadd.f32 %v1308_v9, %v1203_v6 }
 0x287   : > { %1312 = vst [vmem:[%s2940_s24] sm:$0xff] %v1296_v8 }
 0x288   : > { %1313 = vst [vmem:[%s2940_s24 + $0x8] sm:$0xff] %v1309_v10 }
 0x289   : > { %2628 = shalt.err (!%p2625_p5)
}
 0x28a   : > { %2082 = dma.vmem_to_hbm [thread:$0]  (%p2829_p11), %s1329_s12, 256, %s1331_s7, %s1315_s4  }
 0x28b   : > { %p3229_p0 = pmov %p3226_p4 }
 0x28c   : > { %v1297_v11 = vpop.f32.mrf.mxu0 }
 0x28d   : > { %v1310_v12 = vpop.f32.mrf.mxu1 }
 0x28e   : > { %2676 = dma.done.wait (%p3229_p0), [#allocation19], 256   ;;  %p3230_p3 = pmov %p3229_p0 }
 0x290   : > { %2678 = vsyncadd (%p3230_p3), [#allocation19], 4294967040 }
 0x291 PF: > { %s3231_s23 = sld [smem:[#allocation53_spill]]  ;;  %p3233_p10 = scmp.ge.s32.totalorder %s2697_s0, 2 }
 0x293   : > { %p2110_p8 = pnand %p3233_p10, %p2833_p12 }
 0x295   : > { %p2111_p4 = pneg %p2110_p8 }
 0x297   : > { %s1376_s28 = sand.u32 1, %s3231_s23  }
 0x298   : > { %s1377_s8 = scalar_lea.sflag [#allocation10], %s1376_s28 }
 0x299   : > { %2680 = dma.done.wait (%p2111_p4), %s1377_s8, 256  }
 0x29a   : > { %2682 = vsyncadd (%p2111_p4), %s1377_s8, 4294967040  ;;  %s3234_s0 = sld [smem:[#allocation54_spill]]  ;;  %s3236_s17 = smov %s2689_s18 }
 0x29b   : > { %s3235_s21 = sld [smem:[#allocation55_spill]]  ;;  %s3237_s18 = smov %s2693_s19 }
 0x2a0   : > { %p35_p11 = scmp.ge.s32.totalorder %s3234_s0, 4  }
 0x2a1   : > { %s3238_s19 = smov %s3235_s21 }
 0x2a2   :  { %37 = sbr.rel (!%p35_p11) target bundleno = 19 (0x13), region = 194 }
 0x2a7   :  { %1383 = vsyncpa [#allocation9], 1 }
 0x2a8   :  { %1385 = vsyncpa [#allocation9 + $0x1], 1 }
 0x2a9   :  { %1386 = vsyncpa [#allocation12], 1 }
 0x2aa   :  { %1387 = vsyncpa [#allocation15], 1 }
 0x2ab   :  { %1389 = vsyncpa [#allocation15 + $0x1], 1 }
 0x2ac   :  { %1390 = vsyncpa [#allocation10], 1 }
 0x2ad   :  { %1392 = vsyncpa [#allocation10 + $0x1], 1 }
 0x2ae   :  { %1393 = vsyncpa [#allocation19], 1 }
 0x2af   :  { %1394 = vsyncmov [#allocation5] }
 0x2b2   :  { %s1395_s20 = vpop.sfrf %1394 }
 0x2b3   :  { %p1960_p12 = scmp.ne.s32.totalorder %s1395_s20, 0 }
 0x2b5   :  { %1399 = shalt.err (%p1960_p12)  }
 0x2b6   :  { %1401 = vsyncmov [#allocation5 + $0x1] }
 0x2b9   :  { %s1402_s15 = vpop.sfrf %1401 }
 0x2ba   :  { %p1961_p7 = scmp.ne.s32.totalorder %s1402_s15, 0 }
 0x2bc   :  { %1406 = shalt.err (%p1961_p7)  }
 0x2bd   :  { %1408 = vsyncmov [#allocation5 + $0x2] }
 0x2c0   :  { %s1409_s3 = vpop.sfrf %1408 }
 0x2c1   :  { %p1962_p13 = scmp.ne.s32.totalorder %s1409_s3, 0 }
 0x2c3   :  { %1413 = shalt.err (%p1962_p13)  }
 0x2c4   :  { %1415 = vsyncmov [#allocation5 + $0x3] }
 0x2c7   :  { %s1416_s1 = vpop.sfrf %1415 }
 0x2c8   :  { %p1963_p6 = scmp.ne.s32.totalorder %s1416_s1, 0 }
 0x2ca   :  { %1420 = shalt.err (%p1963_p6)  }
 0x2cb   :  { %1422 = vsyncmov [#allocation5 + $0x4] }
 0x2ce   :  { %s1423_s5 = vpop.sfrf %1422 }
 0x2cf   :  { %p1964_p9 = scmp.ne.s32.totalorder %s1423_s5, 0 }
 0x2d1   :  { %1427 = shalt.err (%p1964_p9)  }
 0x2d2   :  { %1429 = vsyncmov [#allocation5 + $0x5] }
 0x2d5   :  { %s1430_s9 = vpop.sfrf %1429 }
 0x2d6   :  { %p1965_p1 = scmp.ne.s32.totalorder %s1430_s9, 0 }
 0x2d8   :  { %1434 = shalt.err (%p1965_p1)  }
 0x2d9   :  { %1436 = vsyncmov [#allocation5 + $0x6] }
 0x2dc   :  { %s1437_s10 = vpop.sfrf %1436 }
 0x2dd   :  { %p1966_p2 = scmp.ne.s32.totalorder %s1437_s10, 0 }
 0x2df   :  { %1441 = shalt.err (%p1966_p2)  }
 0x2e0   :  { %1443 = vsyncmov [#allocation5 + $0x7] }
 0x2e3   :  { %s1444_s18 = vpop.sfrf %1443 }
 0x2e4   :  { %p1967_p5 = scmp.ne.s32.totalorder %s1444_s18, 0 }
 0x2e6   :  { %1448 = shalt.err (%p1967_p5)  }

</bundles_post_ra>
